<compile_context>
chip_gen: v7x
topology: tpu7x:2x2x1
jax: 0.10.0
libtpu: 0.0.40
codegen_flags: <defaults>
</compile_context>

<pallas_src>
import functools

import jax
import jax.numpy as jnp
from jax import lax
from jax.experimental import pallas as pl
from jax.experimental.pallas import tpu as pltpu

LANE = 128


def _round_up(x, m):
    return ((x + m - 1) // m) * m


def _vmem_budget_bytes():
    """Usable per-core VMEM budget.

    ~85% of physical with >=8 MiB headroom for Mosaic internal scratch:
    128 MiB parts (v5e/v6e) -> ~108 MiB, 64 MiB parts (v7x) -> ~54 MiB.
    Falls back to the smallest (v7x-safe) figure if the query is unavailable.
    """
    try:
        phys = int(pltpu.get_tpu_info().vmem_capacity_bytes)
    except Exception:  # best-effort hardware query
        phys = 64 << 20
    return max(16 << 20, min(int(phys * 0.85), phys - (8 << 20)))


def _sepconv_kernel(xp_ref, wdw_ref, wpw_ref, o_ref, dw_ref, *, TH, CH, Wout,
                    Cp, Coutp, KH, KW, stride, dilation):
    """One grid step = one H-strip of one image.

    xp_ref : (1, Hp, Wp, Cp)      whole padded image (resident across strips)
    wdw_ref: (KH, KW, Cp)         depthwise weights, f32
    wpw_ref: (Cp, Coutp)          pointwise weights (MXU operand dtype)
    o_ref  : (1, TH, Wout, Coutp) output strip
    dw_ref : (TH, Wout, Cp)       depthwise-result scratch (matmul operand)
    """
    strip = pl.program_id(1)
    row_base = strip * (TH * stride)
    if (TH * stride) % 8 == 0:
        row_base = pl.multiple_of(row_base, 8)

    n_chunks = TH // CH

    # ---- depthwise conv ----
    # Per chunk of CH output rows: one full-width row-window load per kh tap
    # (aligned; the kw shifts become register-level sublane shifts of the
    # vreg-resident window), f32 accumulation in vregs, and a single bf16
    # store of the chunk into the scratch.
    @pl.loop(0, n_chunks)
    def _chunk(c):
        r0 = row_base + c * (CH * stride)
        acc = jnp.zeros((CH, Wout, Cp), jnp.float32)
        for kh in range(KH):
            if stride == 1:
                win = xp_ref[0, pl.ds(r0 + kh * dilation, CH), :, :]
                win = win.astype(jnp.float32)
                for kw in range(KW):
                    c0 = kw * dilation
                    acc = acc + win[:, c0:c0 + Wout, :] * wdw_ref[kh, kw, :]
            else:
                # TODO(synk): stride>1 is unexercised (Xception uses stride=1
                # here); validate the strided-ds lowering before relying on it.
                for kw in range(KW):
                    patch = xp_ref[0,
                                   pl.ds(r0 + kh * dilation, CH, stride=stride),
                                   pl.ds(kw * dilation, Wout, stride=stride),
                                   :]
                    acc = acc + patch.astype(jnp.float32) * wdw_ref[kh, kw, :]
        dw_ref[pl.ds(c * CH, CH), :, :] = acc.astype(dw_ref.dtype)

    # ---- pointwise 1x1 conv: one big 128-multiple matmul on the MXU ----
    z = dw_ref[...].reshape(TH * Wout, Cp)
    y = jnp.dot(z, wpw_ref[...], preferred_element_type=jnp.float32)
    o_ref[...] = y.reshape(1, TH, Wout, Coutp).astype(o_ref.dtype)


def separable_conv2d(x_nchw, dw_weight, pw_weight, *, kernel_size=3, stride=1,
                     padding=1, dilation=1, max_strip_rows=None,
                     compute_dtype=jnp.bfloat16):
    """Forward pass matching the PyTorch SeparableConv2d module.

    x_nchw   : (N, C, H, W)
    dw_weight: (C, 1, KH, KW)      PyTorch-style depthwise conv weight
    pw_weight: (Cout, C, 1, 1)     PyTorch-style pointwise conv weight
    compute_dtype: storage dtype of the resident image / MXU operands. bf16
                   (default) halves VMEM + HBM traffic; pass jnp.float32 for
                   bit-closer (training-parity) results.
    returns  : (N, Cout, Hout, Wout) in x_nchw.dtype
    """
    N, C, H, W = x_nchw.shape
    KH = KW = kernel_size
    Cout = pw_weight.shape[0]
    Hout = (H + 2 * padding - dilation * (KH - 1) - 1) // stride + 1
    Wout = (W + 2 * padding - dilation * (KW - 1) - 1) // stride + 1
    assert Hout > 0 and Wout > 0

    out_dtype = x_nchw.dtype
    out_itemsize = jnp.dtype(out_dtype).itemsize
    cdt_itemsize = jnp.dtype(compute_dtype).itemsize

    # ---- lane-dense channel padding (dense vst, 128-multiples for the MXU) ----
    Cp = _round_up(C, LANE)
    Coutp = _round_up(Cout, LANE)

    # ---- depthwise chunk height: keep the f32 chunk accumulator vreg-sized ----
    rows_fit = max(1, (64 * 1024) // (Wout * Cp * 4))
    CH = 1
    while CH * 2 <= min(8, rows_fit):
        CH *= 2

    # ---- VMEM budgeting: per-generation cap, image residency, strip height ----
    vmem_cap = _vmem_budget_bytes()
    Wp = W + 2 * padding
    Hp_est = H + 2 * padding                 # final Hp adds < TH pad rows (in headroom)
    img_bytes = Hp_est * Wp * Cp * cdt_itemsize
    w_bytes = KH * KW * Cp * 4 + Cp * Coutp * cdt_itemsize
    headroom = 8 << 20
    # per output row: double-buffered output strip + depthwise scratch
    per_row = Wout * (2 * Coutp * out_itemsize + Cp * cdt_itemsize)

    img_bufs = 2
    if 2 * img_bytes + 2 * w_bytes + headroom + CH * per_row > vmem_cap:
        img_bufs = 1                         # exposed image DMA once per batch
    # TODO(synk): if even a single-buffered image overflows the budget, switch
    #             to the halo'd H-strip DMA path instead of the clamp below.

    avail = vmem_cap - (img_bufs * img_bytes + 2 * w_bytes + headroom)
    max_rows = max(CH, avail // per_row) if avail > 0 else CH

    TH = min(_round_up(Hout, CH), int(max_rows))
    if max_strip_rows is not None:
        TH = min(TH, max(1, int(max_strip_rows)))
    if TH >= CH:
        TH -= TH % CH
    else:
        CH = TH                              # tiny strip: one chunk
    nH = -(-Hout // TH)                      # ceil
    Hout_pad = nH * TH

    # ---- layout glue: NCHW -> NHWC, zero-pad spatial (incl. strip tail) and
    # ---- channel dims; the image is stored in compute_dtype (bf16) ----
    x_nhwc = jnp.transpose(x_nchw.astype(compute_dtype), (0, 2, 3, 1))
    Hp_needed = (Hout_pad - 1) * stride + dilation * (KH - 1) + 1
    extra_bottom = max(0, Hp_needed - (H + 2 * padding))
    x_pad = jnp.pad(x_nhwc, ((0, 0),
                             (padding, padding + extra_bottom),
                             (padding, padding),
                             (0, Cp - C)))
    Hp = x_pad.shape[1]

    # ---- weights: cast once in the wrapper (never inside the kernel) ----
    wdw = jnp.zeros((KH, KW, Cp), jnp.float32).at[:, :, :C].set(
        jnp.transpose(dw_weight[:, 0, :, :], (1, 2, 0)).astype(jnp.float32))
    wpw = jnp.zeros((Cp, Coutp), compute_dtype).at[:C, :Cout].set(
        jnp.transpose(pw_weight[:, :, 0, 0], (1, 0)).astype(compute_dtype))

    kernel = functools.partial(_sepconv_kernel, TH=TH, CH=CH, Wout=Wout, Cp=Cp,
                               Coutp=Coutp, KH=KH, KW=KW, stride=stride,
                               dilation=dilation)

    # explicit VMEM limit from the real block sizes (<= per-generation cap)
    vmem_need = (img_bufs * Hp * Wp * Cp * cdt_itemsize
                 + 2 * TH * Wout * Coutp * out_itemsize
                 + TH * Wout * Cp * cdt_itemsize
                 + 2 * w_bytes + headroom)
    vmem_limit = int(min(max(vmem_need, 16 << 20), vmem_cap))

    # advisory cost estimate so XLA schedules the wrapper glue around the call
    flops = (2 * N * Hout_pad * Wout * Cp * KH * KW          # depthwise
             + 2 * N * Hout_pad * Wout * Cp * Coutp)         # pointwise
    bytes_accessed = (N * Hp * Wp * Cp * cdt_itemsize
                      + KH * KW * Cp * 4 + Cp * Coutp * cdt_itemsize
                      + N * Hout_pad * Wout * Coutp * out_itemsize)
    cost = pl.CostEstimate(flops=int(flops), transcendentals=0,
                           bytes_accessed=int(bytes_accessed))

    img_spec_kwargs = {}
    if img_bufs == 1:
        img_spec_kwargs["pipeline_mode"] = pl.Buffered(1)
    # whole padded image; block index constant along the strip axis -> stays
    # resident in VMEM, no re-DMA per strip.
    img_spec = pl.BlockSpec((1, Hp, Wp, Cp), lambda n, h: (n, 0, 0, 0),
                            **img_spec_kwargs)

    out_padded = pl.pallas_call(
        kernel,
        out_shape=jax.ShapeDtypeStruct((N, Hout_pad, Wout, Coutp), out_dtype),
        grid_spec=pltpu.PrefetchScalarGridSpec(
            num_scalar_prefetch=0,
            grid=(N, nH),
            in_specs=[
                img_spec,
                pl.BlockSpec((KH, KW, Cp), lambda n, h: (0, 0, 0)),
                pl.BlockSpec((Cp, Coutp), lambda n, h: (0, 0)),
            ],
            out_specs=pl.BlockSpec((1, TH, Wout, Coutp),
                                   lambda n, h: (n, h, 0, 0)),
            scratch_shapes=[pltpu.VMEM((TH, Wout, Cp), compute_dtype)],
        ),
        compiler_params=pltpu.CompilerParams(
            dimension_semantics=("parallel", "parallel"),
            vmem_limit_bytes=vmem_limit),
        cost_estimate=cost,
    )(x_pad, wdw, wpw)

    out = out_padded[:, :Hout, :, :Cout]             # drop strip/channel pad
    return jnp.transpose(out, (0, 3, 1, 2))          # NHWC -> NCHW


def _reference(x_nchw, dw_weight, pw_weight, *, stride=1, padding=1,
               dilation=1):
    """Pure-JAX reference (lax convolutions) for the correctness check."""
    C = x_nchw.shape[1]
    y = lax.conv_general_dilated(
        x_nchw, dw_weight,
        window_strides=(stride, stride),
        padding=((padding, padding), (padding, padding)),
        rhs_dilation=(dilation, dilation),
        dimension_numbers=("NCHW", "OIHW", "NCHW"),
        feature_group_count=C)
    y = lax.conv_general_dilated(
        y, pw_weight,
        window_strides=(1, 1),
        padding=((0, 0), (0, 0)),
        dimension_numbers=("NCHW", "OIHW", "NCHW"))
    return y


if __name__ == "__main__":
    # Small, deterministic setup: in_channels=4, out_channels=8, 16x16 input.
    N, C, H, W = 2, 4, 16, 16
    Cout = 8
    KH = KW = 3

    key = jax.random.PRNGKey(0)
    kx, kdw, kpw = jax.random.split(key, 3)

    x = jax.random.normal(kx, (N, C, H, W), dtype=jnp.float32)
    # PyTorch weight shapes: conv1.weight (C,1,KH,KW), pointwise.weight (Cout,C,1,1)
    dw_weight = jax.random.normal(kdw, (C, 1, KH, KW), dtype=jnp.float32) * 0.1
    pw_weight = jax.random.normal(kpw, (Cout, C, 1, 1), dtype=jnp.float32) * 0.1

    ref = _reference(x, dw_weight, pw_weight, stride=1, padding=1, dilation=1)

    # Default path: single H-strip, multiple depthwise chunks (chunk loop hit).
    out1 = separable_conv2d(x, dw_weight, pw_weight, kernel_size=3, stride=1,
                            padding=1, dilation=1)
    out1 = jax.block_until_ready(out1)
    assert out1.shape == (N, Cout, H, W), out1.shape
    # bf16 image / MXU operands (f32 accumulation) => relaxed tolerance vs the
    # all-f32 lax reference.
    assert jnp.allclose(out1, ref, atol=2e-2, rtol=2e-2), "mismatch (default)"

    # Forced strip tiling: exercises the multi-strip grid axis.
    out2 = separable_conv2d(x, dw_weight, pw_weight, kernel_size=3, stride=1,
                            padding=1, dilation=1, max_strip_rows=8)
    out2 = jax.block_until_ready(out2)
    assert jnp.allclose(out2, ref, atol=2e-2, rtol=2e-2), "mismatch (strips)"

    print("KERNEL_OK")
</pallas_src>

<mosaic_0001>
module attributes {stable_mosaic.version = 11 : i64} {
  func.func @_sepconv_kernel(%arg0: i32, %arg1: i32, %arg2: memref<1x18x18x128xbf16, #tpu.memory_space<vmem>>, %arg3: memref<3x3x128xf32, #tpu.memory_space<vmem>>, %arg4: memref<128x128xbf16, #tpu.memory_space<vmem>>, %arg5: memref<1x16x16x128xf32, #tpu.memory_space<vmem>>, %arg6: memref<16x16x128xbf16, #tpu.memory_space<vmem>>) attributes {dimension_semantics = [#tpu.dimension_semantics<parallel>, #tpu.dimension_semantics<parallel>], iteration_bounds = array<i64: 2, 1>, scalar_prefetch = 0 : i64, scratch_operands = 1 : i64, tpu.core_type = #tpu.core_type<tc>, window_params = [{transform_indices = @transform_0, window_bounds = array<i64: 1, 18, 18, 128>}, {pipeline_mode = #tpu.pipeline_mode<synchronous>, transform_indices = @transform_1, window_bounds = array<i64: 3, 3, 128>}, {pipeline_mode = #tpu.pipeline_mode<synchronous>, transform_indices = @transform_2, window_bounds = array<i64: 128, 128>}, {transform_indices = @transform_3, window_bounds = array<i64: 1, 16, 16, 128>}]} {
    %c16_i32 = arith.constant 16 : i32
    %0 = arith.muli %arg1, %c16_i32 : i32
    %1 = tpu.assume_multiple %0, 8 : i32
    %c0_i32 = arith.constant 0 : i32
    %c2_i32 = arith.constant 2 : i32
    %2 = arith.addi %c0_i32, %c2_i32 : i32
    %c1_i32 = arith.constant 1 : i32
    scf.for %arg7 = %c0_i32 to %2 step %c1_i32  : i32 {
      %c1_i32_9 = arith.constant 1 : i32
      %9 = arith.muli %arg7, %c1_i32_9 : i32
      %c0_i32_10 = arith.constant 0 : i32
      %10 = arith.addi %c0_i32_10, %9 : i32
      %c8_i32 = arith.constant 8 : i32
      %11 = arith.muli %10, %c8_i32 : i32
      %12 = arith.addi %1, %11 : i32
      %cst_11 = arith.constant 0.000000e+00 : f32
      %13 = vector.broadcast %cst_11 : f32 to vector<8x16x128xf32>
      %c0_i32_12 = arith.constant 0 : i32
      %14 = arith.addi %12, %c0_i32_12 : i32
      %c0_13 = arith.constant 0 : index
      %15 = arith.index_cast %14 : i32 to index
      %c0_14 = arith.constant 0 : index
      %c0_15 = arith.constant 0 : index
      %16 = vector.load %arg2[%c0_13, %15, %c0_14, %c0_15] : memref<1x18x18x128xbf16, #tpu.memory_space<vmem>>, vector<1x8x18x128xbf16>
      %17 = vector.shape_cast %16 : vector<1x8x18x128xbf16> to vector<8x18x128xbf16>
      %18 = arith.extf %17 : vector<8x18x128xbf16> to vector<8x18x128xf32>
      %19 = vector.extract_strided_slice %18 {offsets = [0, 0, 0], sizes = [8, 16, 128], strides = [1, 1, 1]} : vector<8x18x128xf32> to vector<8x16x128xf32>
      %c0_16 = arith.constant 0 : index
      %c0_17 = arith.constant 0 : index
      %c0_18 = arith.constant 0 : index
      %20 = vector.load %arg3[%c0_16, %c0_17, %c0_18] : memref<3x3x128xf32, #tpu.memory_space<vmem>>, vector<1x1x128xf32>
      %21 = vector.shape_cast %20 : vector<1x1x128xf32> to vector<128xf32>
      %22 = vector.shape_cast %21 : vector<128xf32> to vector<1x1x128xf32>
      %23 = vector.broadcast %22 : vector<1x1x128xf32> to vector<8x16x128xf32>
      %24 = arith.mulf %19, %23 : vector<8x16x128xf32>
      %25 = arith.addf %13, %24 : vector<8x16x128xf32>
      %26 = vector.extract_strided_slice %18 {offsets = [0, 1, 0], sizes = [8, 16, 128], strides = [1, 1, 1]} : vector<8x18x128xf32> to vector<8x16x128xf32>
      %c0_19 = arith.constant 0 : index
      %c1 = arith.constant 1 : index
      %c0_20 = arith.constant 0 : index
      %27 = vector.load %arg3[%c0_19, %c1, %c0_20] : memref<3x3x128xf32, #tpu.memory_space<vmem>>, vector<1x1x128xf32>
      %28 = vector.shape_cast %27 : vector<1x1x128xf32> to vector<128xf32>
      %29 = vector.shape_cast %28 : vector<128xf32> to vector<1x1x128xf32>
      %30 = vector.broadcast %29 : vector<1x1x128xf32> to vector<8x16x128xf32>
      %31 = arith.mulf %26, %30 : vector<8x16x128xf32>
      %32 = arith.addf %25, %31 : vector<8x16x128xf32>
      %33 = vector.extract_strided_slice %18 {offsets = [0, 2, 0], sizes = [8, 16, 128], strides = [1, 1, 1]} : vector<8x18x128xf32> to vector<8x16x128xf32>
      %c0_21 = arith.constant 0 : index
      %c2 = arith.constant 2 : index
      %c0_22 = arith.constant 0 : index
      %34 = vector.load %arg3[%c0_21, %c2, %c0_22] : memref<3x3x128xf32, #tpu.memory_space<vmem>>, vector<1x1x128xf32>
      %35 = vector.shape_cast %34 : vector<1x1x128xf32> to vector<128xf32>
      %36 = vector.shape_cast %35 : vector<128xf32> to vector<1x1x128xf32>
      %37 = vector.broadcast %36 : vector<1x1x128xf32> to vector<8x16x128xf32>
      %38 = arith.mulf %33, %37 : vector<8x16x128xf32>
      %39 = arith.addf %32, %38 : vector<8x16x128xf32>
      %c1_i32_23 = arith.constant 1 : i32
      %40 = arith.addi %12, %c1_i32_23 : i32
      %c0_24 = arith.constant 0 : index
      %41 = arith.index_cast %40 : i32 to index
      %c0_25 = arith.constant 0 : index
      %c0_26 = arith.constant 0 : index
      %42 = vector.load %arg2[%c0_24, %41, %c0_25, %c0_26] : memref<1x18x18x128xbf16, #tpu.memory_space<vmem>>, vector<1x8x18x128xbf16>
      %43 = vector.shape_cast %42 : vector<1x8x18x128xbf16> to vector<8x18x128xbf16>
      %44 = arith.extf %43 : vector<8x18x128xbf16> to vector<8x18x128xf32>
      %45 = vector.extract_strided_slice %44 {offsets = [0, 0, 0], sizes = [8, 16, 128], strides = [1, 1, 1]} : vector<8x18x128xf32> to vector<8x16x128xf32>
      %c1_27 = arith.constant 1 : index
      %c0_28 = arith.constant 0 : index
      %c0_29 = arith.constant 0 : index
      %46 = vector.load %arg3[%c1_27, %c0_28, %c0_29] : memref<3x3x128xf32, #tpu.memory_space<vmem>>, vector<1x1x128xf32>
      %47 = vector.shape_cast %46 : vector<1x1x128xf32> to vector<128xf32>
      %48 = vector.shape_cast %47 : vector<128xf32> to vector<1x1x128xf32>
      %49 = vector.broadcast %48 : vector<1x1x128xf32> to vector<8x16x128xf32>
      %50 = arith.mulf %45, %49 : vector<8x16x128xf32>
      %51 = arith.addf %39, %50 : vector<8x16x128xf32>
      %52 = vector.extract_strided_slice %44 {offsets = [0, 1, 0], sizes = [8, 16, 128], strides = [1, 1, 1]} : vector<8x18x128xf32> to vector<8x16x128xf32>
      %c1_30 = arith.constant 1 : index
      %c1_31 = arith.constant 1 : index
      %c0_32 = arith.constant 0 : index
      %53 = vector.load %arg3[%c1_30, %c1_31, %c0_32] : memref<3x3x128xf32, #tpu.memory_space<vmem>>, vector<1x1x128xf32>
      %54 = vector.shape_cast %53 : vector<1x1x128xf32> to vector<128xf32>
      %55 = vector.shape_cast %54 : vector<128xf32> to vector<1x1x128xf32>
      %56 = vector.broadcast %55 : vector<1x1x128xf32> to vector<8x16x128xf32>
      %57 = arith.mulf %52, %56 : vector<8x16x128xf32>
      %58 = arith.addf %51, %57 : vector<8x16x128xf32>
      %59 = vector.extract_strided_slice %44 {offsets = [0, 2, 0], sizes = [8, 16, 128], strides = [1, 1, 1]} : vector<8x18x128xf32> to vector<8x16x128xf32>
      %c1_33 = arith.constant 1 : index
      %c2_34 = arith.constant 2 : index
      %c0_35 = arith.constant 0 : index
      %60 = vector.load %arg3[%c1_33, %c2_34, %c0_35] : memref<3x3x128xf32, #tpu.memory_space<vmem>>, vector<1x1x128xf32>
      %61 = vector.shape_cast %60 : vector<1x1x128xf32> to vector<128xf32>
      %62 = vector.shape_cast %61 : vector<128xf32> to vector<1x1x128xf32>
      %63 = vector.broadcast %62 : vector<1x1x128xf32> to vector<8x16x128xf32>
      %64 = arith.mulf %59, %63 : vector<8x16x128xf32>
      %65 = arith.addf %58, %64 : vector<8x16x128xf32>
      %c2_i32_36 = arith.constant 2 : i32
      %66 = arith.addi %12, %c2_i32_36 : i32
      %c0_37 = arith.constant 0 : index
      %67 = arith.index_cast %66 : i32 to index
      %c0_38 = arith.constant 0 : index
      %c0_39 = arith.constant 0 : index
      %68 = vector.load %arg2[%c0_37, %67, %c0_38, %c0_39] : memref<1x18x18x128xbf16, #tpu.memory_space<vmem>>, vector<1x8x18x128xbf16>
      %69 = vector.shape_cast %68 : vector<1x8x18x128xbf16> to vector<8x18x128xbf16>
      %70 = arith.extf %69 : vector<8x18x128xbf16> to vector<8x18x128xf32>
      %71 = vector.extract_strided_slice %70 {offsets = [0, 0, 0], sizes = [8, 16, 128], strides = [1, 1, 1]} : vector<8x18x128xf32> to vector<8x16x128xf32>
      %c2_40 = arith.constant 2 : index
      %c0_41 = arith.constant 0 : index
      %c0_42 = arith.constant 0 : index
      %72 = vector.load %arg3[%c2_40, %c0_41, %c0_42] : memref<3x3x128xf32, #tpu.memory_space<vmem>>, vector<1x1x128xf32>
      %73 = vector.shape_cast %72 : vector<1x1x128xf32> to vector<128xf32>
      %74 = vector.shape_cast %73 : vector<128xf32> to vector<1x1x128xf32>
      %75 = vector.broadcast %74 : vector<1x1x128xf32> to vector<8x16x128xf32>
      %76 = arith.mulf %71, %75 : vector<8x16x128xf32>
      %77 = arith.addf %65, %76 : vector<8x16x128xf32>
      %78 = vector.extract_strided_slice %70 {offsets = [0, 1, 0], sizes = [8, 16, 128], strides = [1, 1, 1]} : vector<8x18x128xf32> to vector<8x16x128xf32>
      %c2_43 = arith.constant 2 : index
      %c1_44 = arith.constant 1 : index
      %c0_45 = arith.constant 0 : index
      %79 = vector.load %arg3[%c2_43, %c1_44, %c0_45] : memref<3x3x128xf32, #tpu.memory_space<vmem>>, vector<1x1x128xf32>
      %80 = vector.shape_cast %79 : vector<1x1x128xf32> to vector<128xf32>
      %81 = vector.shape_cast %80 : vector<128xf32> to vector<1x1x128xf32>
      %82 = vector.broadcast %81 : vector<1x1x128xf32> to vector<8x16x128xf32>
      %83 = arith.mulf %78, %82 : vector<8x16x128xf32>
      %84 = arith.addf %77, %83 : vector<8x16x128xf32>
      %85 = vector.extract_strided_slice %70 {offsets = [0, 2, 0], sizes = [8, 16, 128], strides = [1, 1, 1]} : vector<8x18x128xf32> to vector<8x16x128xf32>
      %c2_46 = arith.constant 2 : index
      %c2_47 = arith.constant 2 : index
      %c0_48 = arith.constant 0 : index
      %86 = vector.load %arg3[%c2_46, %c2_47, %c0_48] : memref<3x3x128xf32, #tpu.memory_space<vmem>>, vector<1x1x128xf32>
      %87 = vector.shape_cast %86 : vector<1x1x128xf32> to vector<128xf32>
      %88 = vector.shape_cast %87 : vector<128xf32> to vector<1x1x128xf32>
      %89 = vector.broadcast %88 : vector<1x1x128xf32> to vector<8x16x128xf32>
      %90 = arith.mulf %85, %89 : vector<8x16x128xf32>
      %91 = arith.addf %84, %90 : vector<8x16x128xf32>
      %92 = arith.truncf %91 : vector<8x16x128xf32> to vector<8x16x128xbf16>
      %c8_i32_49 = arith.constant 8 : i32
      %93 = arith.muli %10, %c8_i32_49 : i32
      %94 = arith.index_cast %93 : i32 to index
      %c0_50 = arith.constant 0 : index
      %c0_51 = arith.constant 0 : index
      %95 = vector.load %arg6[%94, %c0_50, %c0_51] : memref<16x16x128xbf16, #tpu.memory_space<vmem>>, vector<8x16x128xbf16>
      tpu.vector_store %arg6[%94, %c0_50, %c0_51], %92 {strides = array<i32>} : memref<16x16x128xbf16, #tpu.memory_space<vmem>>, vector<8x16x128xbf16>,
    }
    %c2_i32_0 = arith.constant 2 : i32
    %c0 = arith.constant 0 : index
    %c0_1 = arith.constant 0 : index
    %c0_2 = arith.constant 0 : index
    %3 = vector.load %arg6[%c0, %c0_1, %c0_2] : memref<16x16x128xbf16, #tpu.memory_space<vmem>>, vector<16x16x128xbf16>
    %4 = vector.shape_cast %3 : vector<16x16x128xbf16> to vector<256x128xbf16>
    %c0_3 = arith.constant 0 : index
    %c0_4 = arith.constant 0 : index
    %5 = vector.load %arg4[%c0_3, %c0_4] : memref<128x128xbf16, #tpu.memory_space<vmem>>, vector<128x128xbf16>
    %cst = arith.constant dense<0.000000e+00> : vector<256x128xf32>
    %6 = tpu.matmul %4, %5, %cst {dimension_numbers = #tpu.dot_dimension_numbers<[1], [0], [0], [1], [0, 0, 1, 1], [], []>} : vector<256x128xbf16>, vector<128x128xbf16>, vector<256x128xf32> -> vector<256x128xf32>
    %7 = vector.shape_cast %6 : vector<256x128xf32> to vector<1x16x16x128xf32>
    %c0_5 = arith.constant 0 : index
    %c0_6 = arith.constant 0 : index
    %c0_7 = arith.constant 0 : index
    %c0_8 = arith.constant 0 : index
    %8 = vector.load %arg5[%c0_5, %c0_6, %c0_7, %c0_8] : memref<1x16x16x128xf32, #tpu.memory_space<vmem>>, vector<1x16x16x128xf32>
    tpu.vector_store %arg5[%c0_5, %c0_6, %c0_7, %c0_8], %7 {strides = array<i32>} : memref<1x16x16x128xf32, #tpu.memory_space<vmem>>, vector<1x16x16x128xf32>,
    return
  }
  func.func @transform_0(%arg0: i32, %arg1: i32) -> (i32, i32, i32, i32) {
    %c0_i32 = arith.constant 0 : i32
    %c0_i32_0 = arith.constant 0 : i32
    %c0_i32_1 = arith.constant 0 : i32
    %c0_i32_2 = arith.constant 0 : i32
    return %arg0, %c0_i32, %c0_i32_0, %c0_i32_1 : i32, i32, i32, i32
  }
  func.func @transform_1(%arg0: i32, %arg1: i32) -> (i32, i32, i32) {
    %c0_i32 = arith.constant 0 : i32
    %c0_i32_0 = arith.constant 0 : i32
    %c0_i32_1 = arith.constant 0 : i32
    %c0_i32_2 = arith.constant 0 : i32
    return %c0_i32, %c0_i32_0, %c0_i32_1 : i32, i32, i32
  }
  func.func @transform_2(%arg0: i32, %arg1: i32) -> (i32, i32) {
    %c0_i32 = arith.constant 0 : i32
    %c0_i32_0 = arith.constant 0 : i32
    %c0_i32_1 = arith.constant 0 : i32
    return %c0_i32, %c0_i32_0 : i32, i32
  }
  func.func @transform_3(%arg0: i32, %arg1: i32) -> (i32, i32, i32, i32) {
    %c0_i32 = arith.constant 0 : i32
    %c0_i32_0 = arith.constant 0 : i32
    %c0_i32_1 = arith.constant 0 : i32
    return %arg0, %arg1, %c0_i32, %c0_i32_0 : i32, i32, i32, i32
  }
}

</mosaic_0001>

<bundles_post_ra>
// kernel: tpu_custom_call.1
= control target key start
LH: loop header
LB: loop body
LE: loop exit
PB: predicated region body
PF: predicated region fallthrough
CT: control target
= control target key end

     0   :  { %8 = vsyncpa [#allocation4], 0  ;;  %s3118_s0 = inlined_call_operand.vmem [shape: bf16[2,18,18,128], index: 0, kind: input, shape index: {}]   ;;  %s3119_s1 = inlined_call_operand.vmem [shape: f32[3,3,128], index: 1, kind: input, shape index: {}]   ;;  %s3120_s2 = inlined_call_operand.vmem [shape: bf16[128,128], index: 2, kind: input, shape index: {}]   ;;  %s3121_s3 = inlined_call_operand.hbm [shape: f32[2,16,16,128], index: 3, kind: output, shape index: {}]  }
   0x1   :  { %10 = vsyncpa [#allocation4 + $0x1], 0  ;;  %s2045_s12 = smov 0   ;;  %s2047_s13 = smov 0  }
   0x2   :  { %s2049_s14 = smov 0   ;;  %s2051_s15 = smov 0  }
   0x3   :  { %s2053_s16 = smov 0   ;;  %s2055_s17 = smov 0  }
   0x4 LB: > { %s1619_s18 = sadd.s32 4294967295, %s2016_s17   ;;  %s1620_s19 = sadd.s32 4294967294, %s2016_s17   ;;  %s2016_s17 = sphi %s2055_s17, %s16_s17   ;;  %s2012_s16 = sphi %s2053_s16, %s3319_s16   ;;  %s2008_s15 = sphi %s2051_s15, %s3318_s15   ;;  %s2004_s14 = sphi %s2049_s14, %s3317_s14   ;;  %s2000_s13 = sphi %s2047_s13, %s3316_s13   ;;  %s1996_s12 = sphi %s2045_s12, %s3315_s12  }
   0x5   : > { %s28_s20 = sadd.s32 1, %s2012_s16  ;;  %s105_s21 = sadd.s32 1, %s2004_s14 }
   0x6   : > { %p30_p0 = scmp.ge.s32.totalorder %s28_s20, 2  ;;  %p115_p1 = scmp.ne.s32.totalorder %s2004_s14, %s2000_s13 }
   0x7   : > { %p116_p2 = scmp.eq.s32.totalorder %s1619_s18, 1  ;;  %p121_p3 = scmp.ne.s32.totalorder %s2000_s13, %s1996_s12 }
   0x8   : > { %s3321_s20 = smov (%p30_p0, %s28_s20), 0  ;;  %p122_p5 = scmp.eq.s32.totalorder %s1620_s19, 1 }
   0x9   : > { %p2085_p4 = por %p116_p2, %p115_p1  ;;  %s100_s23 = ssub.s32 %s2012_s16, %s3321_s20 }
   0xa   : > { %p1623_p6 = scmp.ge.s32.totalorder %s2016_s17, 1  ;;  %p103_p7 = scmp.eq.s32.totalorder %s100_s23, 0 }
   0xb   : > { %p2092_p8 = por %p122_p5, %p121_p3  ;;  %p154_p9 = scmp.lt.s32.totalorder %s2016_s17, 3 }
   0xc   : > { %s2098_s25 = scalar_select %p103_p7, %s2004_s14, %s105_s21  }
   0xd   : > { %p155_p10 = pnand %p1623_p6, %p154_p9 }
   0xe   : > { %s175_s26 = sand.u32 (!%p155_p10), 1, %s2000_s13   ;;  %p178_p11 = scmp.lt.s32.totalorder (!%p155_p10), %s2008_s15, 1 }
   0xf   : > { %158 = sbr.rel (%p155_p10) target bundleno = 481 (0x1e1), region = 32  ;;  %s1624_s27 = sshll.u32 (!%p155_p10), %s175_s26, 8 }
  0x10   : > { %s2110_s6 = scalar_lea.vmem (!%p155_p10), [#allocation3], %s1624_s27  ;;  %s2112_s7 = smov (!%p155_p10), 0  }
  0x16   : > { %s179_s28 = scalar_select %p178_p11, %s2008_s15, 1 }
  0x18   : > { %s1860_s29 = smul.u32 216, %s179_s28 }
  0x1a   : > { %s2108_s5 = scalar_lea.vmem %s3118_s0, %s1860_s29 }
  0x1b LB: >> { %s1710_s8 = smul.u32 96, %s2020_s7  ;;  %v1629_v17 = vld [vmem:[%s3119_s1] ss:$0 sm:$0xff]  ;;  %v1630_v49 = vld [vmem:[%s3119_s1 + $0x1] ss:$0 sm:$0xff]  ;;  %vm335_vm0 = vcmask 1046528   ;;  %s2020_s7 = sphi %s2112_s7, %s191_s7  }
  0x1c   : >> { %vm461_vm1 = vcmask 1045504   ;;  %s1711_s23 = sshll.u32 %s2020_s7, 6  ;;  %s191_s7 = sadd.s32 1, %s2020_s7  }
  0x1d   : >> { %s2119_s9 = scalar_lea.vmem %s2108_s5, %s1710_s8  ;;  %s1223_s27 = scalar_lea.vmem [#allocation2], %s1711_s23 }
  0x1e   : >> { %v1714_v0 = vld [vmem:[%s2119_s9] sm:$0xff]   ;;  %v2123_v1 = vld [vmem:[%s2119_s9 + $0x8] sm:$0x1]  ;;  %v200_v2 = vld [vmem:[%s2119_s9 + $0xc] sm:$0xff]   ;;  %p188_p12 = scmp.ge.s32.totalorder %s191_s7, 2  }
  0x1f   : >> { %v2126_v3 = vunpack.c.l.bf16 %v1714_v0  ;;  %v2128_v4 = vunpack.c.h.bf16 %v1714_v0  ;;  %v2131_v5 = vld [vmem:[%s2119_s9 + $0x14] sm:$0x1]  ;;  %v1761_v6 = vld [vmem:[%s2119_s9 + $0x18] sm:$0xff]   ;;  %v2135_v7 = vld [vmem:[%s2119_s9 + $0x20] sm:$0x1]  ;;  %v3123_v8 = vunpack.c.l.bf16 %v2123_v1  ;;  %v2138_v9 = vunpack.c.l.bf16 %v200_v2  ;;  %s1712_s29 = sshll.u32 (%p188_p12), %s2008_s15, 12 }
  0x20   : >> { %3186 = vst [vmem:[#allocation6_spill] sm:$0xff] %v2135_v7  ;;  %v2140_v10 = vunpack.c.l.bf16 %v1761_v6  ;;  %v2142_v11 = vunpack.c.h.bf16 %v1761_v6  ;;  %v206_v12 = vld [vmem:[%s2119_s9 + $0x24] sm:$0xff]   ;;  %v2146_v13 = vld [vmem:[%s2119_s9 + $0x2c] sm:$0x1]  ;;  %v1762_v14 = vld [vmem:[%s2119_s9 + $0x30] sm:$0xff]   ;;  %v2149_v15 = vunpack.c.h.bf16 %v200_v2  ;;  %v3122_v16 = vunpack.c.l.bf16 %v2131_v5  ;;  %s1522_s30 = sshll.u32 (%p188_p12), %s2110_s6, 4  ;;  %s3060_s10 = scalar_lea.hbm (%p188_p12), %s3121_s3, %s1712_s29  ;;  %s3062_s30 = int_to_ptr.vmem [resolvable:$true] %s1522_s30 }
  0x21   : >> { %3188 = vst [vmem:[#allocation8_spill] sm:$0xff] %v2146_v13  ;;  %v2155_v18 = vunpack.c.l.bf16 %v1762_v14  ;;  %v2157_v19 = vunpack.c.h.bf16 %v1762_v14  ;;  %v2160_v20 = vld [vmem:[%s2119_s9 + $0x38] sm:$0x1]  ;;  %v212_v21 = vld [vmem:[%s2119_s9 + $0x3c] sm:$0xff]   ;;  %v2164_v22 = vld [vmem:[%s2119_s9 + $0x44] sm:$0x1]  ;;  %v3124_v23 = vunpack.c.l.bf16 %v2135_v7  ;;  %v2167_v24 = vunpack.c.l.bf16 %v206_v12 }
  0x22   : >> { %3187 = vst [vmem:[#allocation7_spill] sm:$0xff] %v2142_v11  ;;  %3191 = vst [vmem:[#allocation11_spill] sm:$0xff] %v2160_v20  ;;  %v1763_v25 = vld [vmem:[%s2119_s9 + $0x48] sm:$0xff]   ;;  %v2171_v26 = vld [vmem:[%s2119_s9 + $0x50] sm:$0x1]  ;;  %v2174_v28 = vunpack.c.h.bf16 %v206_v12  ;;  %v3125_v29 = vunpack.c.l.bf16 %v2146_v13  ;;  %v3131_v30 = vunpack.c.l.bf16 %v2160_v20  ;;  %v2178_v31 = vunpack.c.l.bf16 %v212_v21  ;;  %s3072_s15 = scalar_lea.sflag (%p188_p12), [#allocation4], %s175_s26 }
  0x23   : >> { %3189 = vst [vmem:[#allocation9_spill] sm:$0xff] %v2155_v18  ;;  %3190 = vst [vmem:[#allocation10_spill] sm:$0xff] %v2157_v19  ;;  %v218_v27 = vld [vmem:[%s2119_s9 + $0x54] sm:$0xff]   ;;  %v2180_v32 = vunpack.c.l.bf16 %v1763_v25  ;;  %v2182_v33 = vunpack.c.h.bf16 %v1763_v25  ;;  %v2185_v34 = vld [vmem:[%s2119_s9 + $0x5c] sm:$0x1]  ;;  %v2187_v35 = vunpack.c.h.bf16 %v212_v21  ;;  %v3138_v36 = vunpack.c.l.bf16 %v2164_v22  ;;  %s1934_s5 = scalar_lea.vmem (%p188_p12), %s3062_s30, 4096 }
  0x24   : >> { %3192 = vst [vmem:[#allocation12_spill] sm:$0xff] %v2164_v22  ;;  %3193 = vst [vmem:[#allocation13_spill] sm:$0xff] %v2167_v24  ;;  %v2191_v38 = vunpack.c.l.bf16 %v218_v27  ;;  %v2193_v39 = vunpack.c.h.bf16 %v218_v27  ;;  %v2197_v41 = vmul.f32 %v2126_v3, %v1629_v17  ;;  %v2200_v42 = vmul.f32 %v2128_v4, %v1629_v17  ;;  %p1935_p13 = scmp.ne.s32.totalorder (%p188_p12), %s3062_s30, %s1934_s5  ;;  %s2022_s7 = smov (%p188_p12), [#allocation3]  }
  0x25   : >> { %3194 = vst [vmem:[#allocation14_spill] sm:$0xff] %v2171_v26  ;;  %3195 = vst [vmem:[#allocation15_spill] sm:$0xff] %v2174_v28  ;;  %v2203_v43 = vmul.f32 %v1629_v17, %v2138_v9  ;;  %v2206_v44 = vmul.f32 %v1629_v17, %v2149_v15  ;;  %v2209_v45 = vmul.f32 %v2140_v10, %v1629_v17  ;;  %s1938_s11 = sshll.u32 (%p188_p12), %s2022_s7, 4  ;;  %s1939_s11 = int_to_ptr.vmem [resolvable:$false] %s1938_s11 }
  0x26   : >> { %3196 = vst [vmem:[#allocation16_spill] sm:$0xff] %v2178_v31  ;;  %3197 = vst [vmem:[#allocation17_spill] sm:$0xff] %v2180_v32  ;;  %v2212_v46 = vmul.f32 %v2142_v11, %v1629_v17  ;;  %v2215_v47 = vmul.f32 %v1629_v17, %v2167_v24  ;;  %v2218_v48 = vmul.f32 %v1629_v17, %v2174_v28  ;;  %p1936_p0 = pnand (%p188_p12), %p1935_p13, %p2085_p4  ;;  %p1941_p2 = scmp.lt.s32.totalorder (%p188_p12), %s3062_s30, %s1939_s11 }
  0x27   : >> { %3198 = vst [vmem:[#allocation18_spill] sm:$0xff] %v2182_v33  ;;  %3199 = vst [vmem:[#allocation19_spill] sm:$0xff] %v2187_v35  ;;  %v2224_v50 = vmul.f32 %v2155_v18, %v1629_v17  ;;  %v2227_v51 = vmul.f32 %v2157_v19, %v1629_v17  ;;  %v2230_v52 = vmul.f32 %v1629_v17, %v2178_v31 }
  0x28   : >> { %3200 = vst [vmem:[#allocation20_spill] sm:$0xff] %v2191_v38  ;;  %3201 = vst [vmem:[#allocation21_spill] sm:$0xff] %v2193_v39  ;;  %v2233_v53 = vmul.f32 %v1629_v17, %v2187_v35  ;;  %v2236_v54 = vmul.f32 %v2180_v32, %v1629_v17  ;;  %v2239_v55 = vmul.f32 %v2182_v33, %v1629_v17  ;;  %p1937_p1 = pneg (%p188_p12), %p1936_p0 }
  0x29   : >> { %v2242_v56 = vmul.f32 %v1629_v17, %v2191_v38  ;;  %v2245_v57 = vmul.f32 %v1629_v17, %v2193_v39  ;;  %v287_v58 = vmul.f32 %v2126_v3, %v1630_v49  ;;  %v288_v59 = vmul.f32 %v2128_v4, %v1630_v49 }
  0x2a   : >> { %v289_v60 = vmul.f32 %v1630_v49, %v3123_v8  ;;  %v290_v61 = vmul.f32 %v1630_v49, %v2138_v9  ;;  %v291_v62 = vmul.f32 %v1630_v49, %v2149_v15  ;;  %v292_v63 = vmul.f32 %v1630_v49, %v3122_v16 }
  0x2b   : >> { %v293_v0 = vmul.f32 %v2140_v10, %v1630_v49  ;;  %v294_v2 = vmul.f32 %v2142_v11, %v1630_v49  ;;  %v295_v6 = vmul.f32 %v1630_v49, %v3124_v23  ;;  %v296_v12 = vmul.f32 %v1630_v49, %v2167_v24 }
  0x2c   : >> { %v297_v14 = vmul.f32 %v1630_v49, %v2174_v28  ;;  %v298_v17 = vmul.f32 %v1630_v49, %v3125_v29  ;;  %v299_v21 = vmul.f32 %v2155_v18, %v1630_v49  ;;  %v300_v25 = vmul.f32 %v2157_v19, %v1630_v49 }
  0x2d   : >> { %v301_v27 = vmul.f32 %v1630_v49, %v3131_v30  ;;  %v302_v16 = vmul.f32 %v1630_v49, %v2178_v31  ;;  %v303_v8 = vmul.f32 %v1630_v49, %v2187_v35  ;;  %v304_v23 = vmul.f32 %v1630_v49, %v3138_v36 }
  0x2e   : >> { %v305_v40 = vmul.f32 %v2180_v32, %v1630_v49  ;;  %v306_v37 = vmul.f32 %v2182_v33, %v1630_v49  ;;  %v3202_v29 = vunpack.c.l.bf16 %v2171_v26  ;;  %v308_v18 = vmul.f32 %v1630_v49, %v2191_v38 }
  0x2f   : >> { %v309_v19 = vmul.f32 %v1630_v49, %v2193_v39  ;;  %v3203_v30 = vunpack.c.l.bf16 %v2185_v34  ;;  %v336_v31 = vrot.slane %v287_v58, 1  ;;  %v337_v28 = vrot.slane %v288_v59, 1 }
  0x30   : >> { %v307_v13 = vmul.f32 %v1630_v49, %v3202_v29  ;;  %v339_v35 = vrot.slane %v289_v60, 1  ;;  %v341_v24 = vrot.slane %v290_v61, 1  ;;  %v342_v22 = vrot.slane %v291_v62, 1 }
  0x31   : >> { %v310_v20 = vmul.f32 %v1630_v49, %v3203_v30  ;;  %v344_v36 = vrot.slane %v292_v63, 1  ;;  %v346_v7 = vrot.slane %v293_v0, 1  ;;  %v347_v32 = vrot.slane %v294_v2, 1 }
  0x32   : >> { %v338_v33 = vsel %vm335_vm0, %v336_v31, %v337_v28  ;;  %v340_v26 = vsel %vm335_vm0, %v337_v28, %v339_v35  ;;  %v349_v29 = vrot.slane %v295_v6, 1  ;;  %v351_v11 = vrot.slane %v296_v12, 1 }
  0x33   : >> { %v343_v38 = vsel %vm335_vm0, %v341_v24, %v342_v22  ;;  %v345_v39 = vsel %vm335_vm0, %v342_v22, %v344_v36  ;;  %v348_v30 = vsel %vm335_vm0, %v346_v7, %v347_v32  ;;  %v352_v49 = vrot.slane %v297_v14, 1 }
  0x34   : >> { %v350_v58 = vsel %vm335_vm0, %v347_v32, %v349_v29  ;;  %v354_v59 = vrot.slane %v298_v17, 1  ;;  %v356_v60 = vrot.slane %v299_v21, 1  ;;  %v357_v61 = vrot.slane %v300_v25, 1  ;;  %v3206_v25 = vld [vmem:[#allocation7_spill] sm:$0xff] }
  0x35   : >> { %v353_v62 = vsel %vm335_vm0, %v351_v11, %v352_v49  ;;  %v359_v63 = vrot.slane %v301_v27, 1  ;;  %v361_v31 = vrot.slane %v302_v16, 1  ;;  %v362_v0 = vrot.slane %v303_v8, 1 }
  0x36   : >> { %v355_v28 = vsel %vm335_vm0, %v352_v49, %v354_v59  ;;  %v358_v35 = vsel %vm335_vm0, %v356_v60, %v357_v61  ;;  %v364_v24 = vrot.slane %v304_v23, 1  ;;  %v366_v2 = vrot.slane %v305_v40, 1 }
  0x37   : >> { %v360_v22 = vsel %vm335_vm0, %v357_v61, %v359_v63  ;;  %v363_v7 = vsel %vm335_vm0, %v361_v31, %v362_v0  ;;  %v367_v36 = vrot.slane %v306_v37, 1  ;;  %v369_v32 = vrot.slane %v307_v13, 1 }
  0x38   : >> { %v365_v6 = vsel %vm335_vm0, %v362_v0, %v364_v24  ;;  %v371_v12 = vrot.slane %v308_v18, 1  ;;  %v372_v14 = vrot.slane %v309_v19, 1  ;;  %v374_v11 = vrot.slane %v310_v20, 1  ;;  %v3217_v0 = vld [vmem:[#allocation16_spill] sm:$0xff] }
  0x39   : >> { %v368_v16 = vsel %vm335_vm0, %v366_v2, %v367_v36  ;;  %v370_v8 = vsel %vm335_vm0, %v367_v36, %v369_v32  ;;  %v2294_v17 = vadd.f32 %v338_v33, %v2197_v41  ;;  %v2297_v23 = vadd.f32 %v340_v26, %v2200_v42  ;;  %v3219_v2 = vld [vmem:[#allocation12_spill] sm:$0xff]  ;;  %v3221_v36 = vld [vmem:[#allocation17_spill] sm:$0xff] }
  0x3a   : >> { %v373_v40 = vsel %vm335_vm0, %v371_v12, %v372_v14  ;;  %v375_v37 = vsel %vm335_vm0, %v372_v14, %v374_v11  ;;  %v2302_v13 = vadd.f32 %v343_v38, %v2203_v43  ;;  %v2305_v18 = vadd.f32 %v345_v39, %v2206_v44  ;;  %v1631_v38 = vld [vmem:[%s3119_s1 + $0x2] ss:$0 sm:$0xff]  ;;  %v3223_v14 = vld [vmem:[#allocation14_spill] sm:$0xff] }
  0x3b   : >> { %v2308_v19 = vadd.f32 %v348_v30, %v2209_v45  ;;  %v2311_v20 = vadd.f32 %v350_v58, %v2212_v46  ;;  %v2314_v33 = vadd.f32 %v353_v62, %v2215_v47  ;;  %v2317_v26 = vadd.f32 %v355_v28, %v2218_v48 }
  0x3c   : >> { %v2323_v39 = vadd.f32 %v358_v35, %v2224_v50  ;;  %v2326_v41 = vadd.f32 %v360_v22, %v2227_v51  ;;  %v2329_v42 = vadd.f32 %v363_v7, %v2230_v52  ;;  %v2332_v43 = vadd.f32 %v365_v6, %v2233_v53  ;;  %v3218_v35 = vld [vmem:[#allocation19_spill] sm:$0xff]  ;;  %v3222_v6 = vld [vmem:[#allocation18_spill] sm:$0xff] }
  0x3d   : >> { %v2335_v44 = vadd.f32 %v368_v16, %v2236_v54  ;;  %v2338_v45 = vadd.f32 %v370_v8, %v2239_v55  ;;  %v2341_v46 = vadd.f32 %v373_v40, %v2242_v56  ;;  %v2344_v47 = vadd.f32 %v375_v37, %v2245_v57  ;;  %v3207_v57 = vld [vmem:[#allocation6_spill] sm:$0xff]  ;;  %v3225_v8 = vld [vmem:[#allocation20_spill] sm:$0xff]  ;;  %v3226_v37 = vld [vmem:[#allocation21_spill] sm:$0xff] }
  0x3e   : >> { %v413_v48 = vmul.f32 %v2126_v3, %v1631_v38  ;;  %v414_v50 = vmul.f32 %v2128_v4, %v1631_v38  ;;  %v3204_v51 = vunpack.c.l.bf16 %v2123_v1  ;;  %v416_v53 = vmul.f32 %v1631_v38, %v2138_v9  ;;  %v3209_v3 = vld [vmem:[#allocation13_spill] sm:$0xff]  ;;  %v3210_v4 = vld [vmem:[#allocation15_spill] sm:$0xff]  ;;  %v3211_v1 = vld [vmem:[#allocation8_spill] sm:$0xff] }
  0x3f   : >> { %v417_v54 = vmul.f32 %v1631_v38, %v2149_v15  ;;  %v3205_v55 = vunpack.c.l.bf16 %v2131_v5  ;;  %v419_v56 = vmul.f32 %v2140_v10, %v1631_v38  ;;  %v420_v27 = vmul.f32 %v3206_v25, %v1631_v38  ;;  %v3213_v9 = vld [vmem:[#allocation9_spill] sm:$0xff]  ;;  %v3214_v15 = vld [vmem:[#allocation10_spill] sm:$0xff]  ;;  %v3215_v5 = vld [vmem:[#allocation11_spill] sm:$0xff] }
  0x40   : >> { %v415_v52 = vmul.f32 %v1631_v38, %v3204_v51  ;;  %v3208_v29 = vunpack.c.l.bf16 %v3207_v57  ;;  %v422_v49 = vmul.f32 %v1631_v38, %v3209_v3  ;;  %v423_v58 = vmul.f32 %v1631_v38, %v3210_v4 }
  0x41   : >> { %v418_v21 = vmul.f32 %v1631_v38, %v3205_v55  ;;  %v3212_v59 = vunpack.c.l.bf16 %v3211_v1  ;;  %v425_v61 = vmul.f32 %v3213_v9, %v1631_v38  ;;  %v426_v62 = vmul.f32 %v3214_v15, %v1631_v38 }
  0x42   : >> { %v421_v30 = vmul.f32 %v1631_v38, %v3208_v29  ;;  %v3216_v63 = vunpack.c.l.bf16 %v3215_v5  ;;  %v428_v28 = vmul.f32 %v1631_v38, %v3217_v0  ;;  %v429_v24 = vmul.f32 %v1631_v38, %v3218_v35 }
  0x43   : >> { %v424_v60 = vmul.f32 %v1631_v38, %v3212_v59  ;;  %v3220_v22 = vunpack.c.l.bf16 %v3219_v2  ;;  %v431_v32 = vmul.f32 %v3221_v36, %v1631_v38  ;;  %v432_v12 = vmul.f32 %v3222_v6, %v1631_v38 }
  0x44   : >> { %v427_v31 = vmul.f32 %v1631_v38, %v3216_v63  ;;  %v3224_v11 = vunpack.c.l.bf16 %v3223_v14  ;;  %v434_v40 = vmul.f32 %v1631_v38, %v3225_v8  ;;  %v435_v51 = vmul.f32 %v1631_v38, %v3226_v37 }
  0x45   : >> { %v430_v7 = vmul.f32 %v1631_v38, %v3220_v22  ;;  %v3227_v55 = vunpack.c.l.bf16 %v2185_v34  ;;  %v462_v29 = vrot.slane %v413_v48, 2  ;;  %v463_v3 = vrot.slane %v414_v50, 2 }
  0x46   : >> { %v433_v16 = vmul.f32 %v1631_v38, %v3224_v11  ;;  %v465_v4 = vrot.slane %v415_v52, 2  ;;  %v467_v1 = vrot.slane %v416_v53, 2  ;;  %v468_v59 = vrot.slane %v417_v54, 2 }
  0x47   : >> { %v436_v57 = vmul.f32 %v1631_v38, %v3227_v55  ;;  %v470_v5 = vrot.slane %v418_v21, 2  ;;  %v472_v63 = vrot.slane %v419_v56, 2  ;;  %v473_v0 = vrot.slane %v420_v27, 2 }
  0x48   : >> { %v464_v35 = vsel %vm461_vm1, %v462_v29, %v463_v3  ;;  %v466_v2 = vsel %vm461_vm1, %v463_v3, %v465_v4  ;;  %v475_v22 = vrot.slane %v421_v30, 2  ;;  %v477_v14 = vrot.slane %v422_v49, 2 }
  0x49   : >> { %v469_v11 = vsel %vm461_vm1, %v467_v1, %v468_v59  ;;  %v471_v8 = vsel %vm461_vm1, %v468_v59, %v470_v5  ;;  %v474_v34 = vsel %vm461_vm1, %v472_v63, %v473_v0  ;;  %v478_v38 = vrot.slane %v423_v58, 2  ;;  %v1767_v59 = vld [vmem:[%s2119_s9 + $0x60] sm:$0xff]  }
  0x4a   : >> { %v476_v48 = vsel %vm461_vm1, %v473_v0, %v475_v22  ;;  %v480_v50 = vrot.slane %v424_v60, 2  ;;  %v482_v52 = vrot.slane %v425_v61, 2  ;;  %v483_v53 = vrot.slane %v426_v62, 2  ;;  %v2436_v5 = vld [vmem:[%s2119_s9 + $0x20] sm:$0x1]  ;;  %v1640_v63 = vld [vmem:[%s2119_s9 + $0x24] sm:$0xff]  }
  0x4b   : >> { %v479_v54 = vsel %vm461_vm1, %v477_v14, %v478_v38  ;;  %v485_v21 = vrot.slane %v427_v31, 2  ;;  %v487_v56 = vrot.slane %v428_v28, 2  ;;  %v488_v27 = vrot.slane %v429_v24, 2  ;;  %v2451_v22 = vld [vmem:[%s2119_s9 + $0x44] sm:$0x1] }
  0x4c   : >> { %v481_v30 = vsel %vm461_vm1, %v478_v38, %v480_v50  ;;  %v484_v49 = vsel %vm461_vm1, %v482_v52, %v483_v53  ;;  %v490_v37 = vrot.slane %v430_v7, 2  ;;  %v492_v55 = vrot.slane %v431_v32, 2  ;;  %3230 = vst [vmem:[#allocation13_spill] sm:$0xff] %v2451_v22  ;;  %v2454_v14 = vld [vmem:[%s2119_s9 + $0x50] sm:$0x1] }
  0x4d   : >> { %v486_v29 = vsel %vm461_vm1, %v483_v53, %v485_v21  ;;  %v489_v58 = vsel %vm461_vm1, %v487_v56, %v488_v27  ;;  %v493_v3 = vrot.slane %v432_v12, 2  ;;  %v495_v4 = vrot.slane %v433_v16, 2  ;;  %3231 = vst [vmem:[#allocation15_spill] sm:$0xff] %v2454_v14  ;;  %v1659_v53 = vld [vmem:[%s3119_s1 + $0x4] ss:$0 sm:$0xff] }
  0x4e   : >> { %v491_v60 = vsel %vm461_vm1, %v488_v27, %v490_v37  ;;  %v497_v61 = vrot.slane %v434_v40, 2  ;;  %v498_v62 = vrot.slane %v435_v51, 2  ;;  %v500_v31 = vrot.slane %v436_v57, 2 }
  0x4f   : >> { %v494_v28 = vsel %vm461_vm1, %v492_v55, %v493_v3  ;;  %v496_v24 = vsel %vm461_vm1, %v493_v3, %v495_v4  ;;  %v2393_v7 = vadd.f32 %v464_v35, %v2294_v17  ;;  %v2396_v32 = vadd.f32 %v466_v2, %v2297_v23  ;;  %v2447_v2 = vld [vmem:[%s2119_s9 + $0x38] sm:$0x1] }
  0x50   : >> { %v499_v12 = vsel %vm461_vm1, %v497_v61, %v498_v62  ;;  %v501_v16 = vsel %vm461_vm1, %v498_v62, %v500_v31  ;;  %v2401_v40 = vadd.f32 %v469_v11, %v2302_v13  ;;  %v2404_v51 = vadd.f32 %v471_v8, %v2305_v18  ;;  %v1634_v13 = vld [vmem:[%s2119_s9 + $0xc] sm:$0xff]   ;;  %3229 = vst [vmem:[#allocation6_spill] sm:$0xff] %v2447_v2  ;;  %v1652_v11 = vld [vmem:[%s2119_s9 + $0x54] sm:$0xff]  }
  0x51   : >> { %v2407_v57 = vadd.f32 %v474_v34, %v2308_v19  ;;  %v2410_v17 = vadd.f32 %v476_v48, %v2311_v20  ;;  %v2413_v23 = vadd.f32 %v479_v54, %v2314_v33  ;;  %v2416_v1 = vadd.f32 %v481_v30, %v2317_v26  ;;  %v2433_v26 = vld [vmem:[%s2119_s9 + $0x14] sm:$0x1] }
  0x52   : >> { %v2421_v18 = vadd.f32 %v484_v49, %v2323_v39  ;;  %v2424_v19 = vadd.f32 %v486_v29, %v2326_v41  ;;  %v2427_v20 = vadd.f32 %v489_v58, %v2329_v42  ;;  %v2430_v33 = vadd.f32 %v491_v60, %v2332_v43  ;;  %v2444_v42 = vld [vmem:[%s2119_s9 + $0x2c] sm:$0x1]  ;;  %v1646_v43 = vld [vmem:[%s2119_s9 + $0x3c] sm:$0xff]  }
  0x53   : >> { %v530_v39 = vadd.f32 %v494_v28, %v2335_v44  ;;  %v531_v0 = vadd.f32 %v496_v24, %v2338_v45  ;;  %v532_v41 = vadd.f32 %v499_v12, %v2341_v46  ;;  %v533_v35 = vadd.f32 %v501_v16, %v2344_v47  ;;  %3228 = vst [vmem:[#allocation7_spill] sm:$0xff] %v2444_v42  ;;  %v2466_v46 = vld [vmem:[%s2119_s9 + $0x5c] sm:$0x1]  ;;  %v2469_v47 = vld [vmem:[%s2119_s9 + $0x68] sm:$0x1] }
  0x54   : >> { %v2457_v8 = vunpack.c.l.bf16 %v1767_v59  ;;  %v2459_v34 = vunpack.c.h.bf16 %v1767_v59  ;;  %v2461_v44 = vunpack.c.l.bf16 %v1634_v13  ;;  %v2463_v45 = vunpack.c.h.bf16 %v1634_v13  ;;  %3234 = vst [vmem:[#allocation16_spill] sm:$0xff] %v2466_v46 }
  0x55   : >> { %v3149_v38 = vunpack.c.l.bf16 %v2433_v26  ;;  %v2473_v50 = vunpack.c.l.bf16 %v1640_v63  ;;  %v2475_v52 = vunpack.c.h.bf16 %v1640_v63  ;;  %v2482_v56 = vunpack.c.l.bf16 %v1646_v43 }
  0x56   : >> { %3232 = vst [vmem:[#allocation8_spill] sm:$0xff] %v2457_v8  ;;  %3233 = vst [vmem:[#allocation11_spill] sm:$0xff] %v2459_v34  ;;  %v2484_v27 = vunpack.c.h.bf16 %v1646_v43  ;;  %v2488_v37 = vunpack.c.l.bf16 %v1652_v11  ;;  %v2490_v55 = vunpack.c.h.bf16 %v1652_v11  ;;  %v592_v3 = vmul.f32 %v1659_v53, %v2461_v44 }
  0x57   : >> { %3235 = vst [vmem:[#allocation19_spill] sm:$0xff] %v2475_v52  ;;  %3236 = vst [vmem:[#allocation12_spill] sm:$0xff] %v2482_v56  ;;  %v593_v4 = vmul.f32 %v1659_v53, %v2463_v45  ;;  %v594_v60 = vmul.f32 %v2140_v10, %v1659_v53  ;;  %v595_v61 = vmul.f32 %v3206_v25, %v1659_v53 }
  0x58   : >> { %3237 = vst [vmem:[#allocation14_spill] sm:$0xff] %v2484_v27  ;;  %3238 = vst [vmem:[#allocation20_spill] sm:$0xff] %v2488_v37  ;;  %v596_v62 = vmul.f32 %v1659_v53, %v2473_v50  ;;  %v597_v31 = vmul.f32 %v1659_v53, %v2475_v52  ;;  %v598_v28 = vmul.f32 %v3213_v9, %v1659_v53 }
  0x59   : >> { %3239 = vst [vmem:[#allocation21_spill] sm:$0xff] %v2490_v55  ;;  %v599_v24 = vmul.f32 %v3214_v15, %v1659_v53  ;;  %v600_v12 = vmul.f32 %v1659_v53, %v2482_v56  ;;  %v601_v16 = vmul.f32 %v1659_v53, %v2484_v27  ;;  %v602_v13 = vmul.f32 %v3221_v36, %v1659_v53 }
  0x5a   : >> { %v603_v59 = vmul.f32 %v3222_v6, %v1659_v53  ;;  %v604_v63 = vmul.f32 %v1659_v53, %v2488_v37  ;;  %v605_v43 = vmul.f32 %v1659_v53, %v2490_v55  ;;  %v606_v11 = vmul.f32 %v2457_v8, %v1659_v53 }
  0x5b   : >> { %v607_v58 = vmul.f32 %v2459_v34, %v1659_v53  ;;  %v2511_v29 = vadd.f32 %v592_v3, %v2393_v7  ;;  %v2514_v49 = vadd.f32 %v593_v4, %v2396_v32  ;;  %v2517_v30 = vadd.f32 %v594_v60, %v2401_v40  ;;  %v1661_v7 = vld [vmem:[%s3119_s1 + $0x5] ss:$0 sm:$0xff] }
  0x5c   : >> { %v2520_v21 = vadd.f32 %v595_v61, %v2404_v51  ;;  %v2523_v54 = vadd.f32 %v596_v62, %v2407_v57  ;;  %v2526_v48 = vadd.f32 %v597_v31, %v2410_v17  ;;  %v2532_v53 = vadd.f32 %v598_v28, %v2413_v23 }
  0x5d   : >> { %v2535_v32 = vadd.f32 %v599_v24, %v2416_v1  ;;  %v2538_v40 = vadd.f32 %v600_v12, %v2421_v18  ;;  %v2541_v51 = vadd.f32 %v601_v16, %v2424_v19  ;;  %v2544_v57 = vadd.f32 %v602_v13, %v2427_v20 }
  0x5e   : >> { %v2547_v17 = vadd.f32 %v603_v59, %v2430_v33  ;;  %v2549_v3 = vadd.f32 %v604_v63, %v530_v39  ;;  %v2551_v4 = vadd.f32 %v605_v43, %v531_v0  ;;  %v2553_v23 = vadd.f32 %v606_v11, %v532_v41 }
  0x5f   : >> { %v2555_v1 = vadd.f32 %v607_v58, %v533_v35  ;;  %v629_v18 = vmul.f32 %v1661_v7, %v2461_v44  ;;  %v630_v60 = vmul.f32 %v1661_v7, %v2463_v45  ;;  %v631_v19 = vmul.f32 %v1661_v7, %v3149_v38 }
  0x60   : >> { %v632_v20 = vmul.f32 %v2140_v10, %v1661_v7  ;;  %v633_v33 = vmul.f32 %v3206_v25, %v1661_v7  ;;  %v3240_v39 = vunpack.c.l.bf16 %v2436_v5  ;;  %v635_v0 = vmul.f32 %v1661_v7, %v2473_v50 }
  0x61   : >> { %v636_v41 = vmul.f32 %v1661_v7, %v2475_v52  ;;  %v3241_v35 = vunpack.c.l.bf16 %v2444_v42  ;;  %v638_v62 = vmul.f32 %v3213_v9, %v1661_v7  ;;  %v639_v31 = vmul.f32 %v3214_v15, %v1661_v7 }
  0x62   : >> { %v634_v61 = vmul.f32 %v1661_v7, %v3240_v39  ;;  %v3242_v28 = vunpack.c.l.bf16 %v2447_v2  ;;  %v641_v12 = vmul.f32 %v1661_v7, %v2482_v56  ;;  %v642_v16 = vmul.f32 %v1661_v7, %v2484_v27 }
  0x63   : >> { %v637_v58 = vmul.f32 %v1661_v7, %v3241_v35  ;;  %v3243_v13 = vunpack.c.l.bf16 %v2451_v22  ;;  %v644_v63 = vmul.f32 %v3221_v36, %v1661_v7  ;;  %v645_v43 = vmul.f32 %v3222_v6, %v1661_v7 }
  0x64   : >> { %v640_v24 = vmul.f32 %v1661_v7, %v3242_v28  ;;  %v3244_v11 = vunpack.c.l.bf16 %v2454_v14  ;;  %v647_v35 = vmul.f32 %v1661_v7, %v2488_v37  ;;  %v648_v38 = vmul.f32 %v1661_v7, %v2490_v55 }
  0x65   : >> { %v643_v59 = vmul.f32 %v1661_v7, %v3243_v13  ;;  %v3245_v28 = vunpack.c.l.bf16 %v2466_v46  ;;  %v650_v56 = vmul.f32 %v2457_v8, %v1661_v7  ;;  %v651_v27 = vmul.f32 %v2459_v34, %v1661_v7 }
  0x66   : >> { %v646_v39 = vmul.f32 %v1661_v7, %v3244_v11  ;;  %v3246_v13 = vunpack.c.l.bf16 %v2469_v47  ;;  %v677_v36 = vrot.slane %v629_v18, 1  ;;  %v678_v15 = vrot.slane %v630_v60, 1 }
  0x67   : >> { %v649_v2 = vmul.f32 %v1661_v7, %v3245_v28  ;;  %v680_v6 = vrot.slane %v631_v19, 1  ;;  %v682_v9 = vrot.slane %v632_v20, 1  ;;  %v683_v14 = vrot.slane %v633_v33, 1 }
  0x68   : >> { %v652_v22 = vmul.f32 %v1661_v7, %v3246_v13  ;;  %v685_v11 = vrot.slane %v634_v61, 1  ;;  %v679_v37 = vsel %vm335_vm0, %v677_v36, %v678_v15  ;;  %v687_v42 = vrot.slane %v635_v0, 1  ;;  %v3249_v13 = vld [vmem:[#allocation19_spill] sm:$0xff] }
  0x69   : >> { %v688_v55 = vrot.slane %v636_v41, 1  ;;  %v690_v52 = vrot.slane %v637_v58, 1  ;;  %v681_v28 = vsel %vm335_vm0, %v678_v15, %v680_v6  ;;  %v684_v8 = vsel %vm335_vm0, %v682_v9, %v683_v14 }
  0x6a   : >> { %v686_v34 = vsel %vm335_vm0, %v683_v14, %v685_v11  ;;  %v692_v46 = vrot.slane %v638_v62, 1  ;;  %v693_v60 = vrot.slane %v639_v31, 1  ;;  %v695_v19 = vrot.slane %v640_v24, 1 }
  0x6b   : >> { %v689_v7 = vsel %vm335_vm0, %v687_v42, %v688_v55  ;;  %v691_v18 = vsel %vm335_vm0, %v688_v55, %v690_v52  ;;  %v697_v20 = vrot.slane %v641_v12, 1  ;;  %v698_v33 = vrot.slane %v642_v16, 1 }
  0x6c   : >> { %v700_v61 = vrot.slane %v643_v59, 1  ;;  %v702_v36 = vrot.slane %v644_v63, 1  ;;  %v694_v0 = vsel %vm335_vm0, %v692_v46, %v693_v60  ;;  %v696_v41 = vsel %vm335_vm0, %v693_v60, %v695_v19 }
  0x6d   : >> { %v703_v15 = vrot.slane %v645_v43, 1  ;;  %v705_v6 = vrot.slane %v646_v39, 1  ;;  %v699_v9 = vsel %vm335_vm0, %v697_v20, %v698_v33  ;;  %v707_v58 = vrot.slane %v647_v35, 1 }
  0x6e   : >> { %v701_v14 = vsel %vm335_vm0, %v698_v33, %v700_v61  ;;  %v708_v42 = vrot.slane %v648_v38, 1  ;;  %v710_v62 = vrot.slane %v649_v2, 1  ;;  %v712_v31 = vrot.slane %v650_v56, 1  ;;  %v3256_v33 = vld [vmem:[#allocation12_spill] sm:$0xff] }
  0x6f   : >> { %v704_v52 = vsel %vm335_vm0, %v702_v36, %v703_v15  ;;  %v706_v55 = vsel %vm335_vm0, %v703_v15, %v705_v6  ;;  %v713_v12 = vrot.slane %v651_v27, 1  ;;  %v715_v46 = vrot.slane %v652_v22, 1  ;;  %v3257_v36 = vld [vmem:[#allocation14_spill] sm:$0xff] }
  0x70   : >> { %v709_v24 = vsel %vm335_vm0, %v707_v58, %v708_v42  ;;  %v2603_v16 = vadd.f32 %v679_v37, %v2511_v29  ;;  %v711_v59 = vsel %vm335_vm0, %v708_v42, %v710_v62  ;;  %v2607_v63 = vadd.f32 %v681_v28, %v2514_v49  ;;  %v1663_v49 = vld [vmem:[%s3119_s1 + $0x6] ss:$0 sm:$0xff]  ;;  %v3262_v58 = vld [vmem:[#allocation15_spill] sm:$0xff] }
  0x71   : >> { %v2610_v38 = vadd.f32 %v684_v8, %v2517_v30  ;;  %v2613_v43 = vadd.f32 %v686_v34, %v2520_v21  ;;  %v714_v2 = vsel %vm335_vm0, %v712_v31, %v713_v12  ;;  %v716_v56 = vsel %vm335_vm0, %v713_v12, %v715_v46  ;;  %v3265_v31 = vld [vmem:[#allocation21_spill] sm:$0xff]  ;;  %v3266_v12 = vld [vmem:[#allocation16_spill] sm:$0xff] }
  0x72   : >> { %v2618_v22 = vadd.f32 %v689_v7, %v2523_v54  ;;  %v2621_v27 = vadd.f32 %v691_v18, %v2526_v48  ;;  %v2627_v8 = vadd.f32 %v694_v0, %v2532_v53  ;;  %v2630_v34 = vadd.f32 %v696_v41, %v2535_v32 }
  0x73   : >> { %v2633_v21 = vadd.f32 %v699_v9, %v2538_v40  ;;  %v2636_v30 = vadd.f32 %v701_v14, %v2541_v51  ;;  %v2639_v54 = vadd.f32 %v704_v52, %v2544_v57  ;;  %v2642_v48 = vadd.f32 %v706_v55, %v2547_v17  ;;  %v3261_v9 = vld [vmem:[#allocation18_spill] sm:$0xff]  ;;  %v3264_v55 = vld [vmem:[#allocation20_spill] sm:$0xff] }
  0x74   : >> { %v2645_v37 = vadd.f32 %v709_v24, %v2549_v3  ;;  %v2648_v29 = vadd.f32 %v711_v59, %v2551_v4  ;;  %v2651_v53 = vadd.f32 %v714_v2, %v2553_v23  ;;  %v2654_v32 = vadd.f32 %v716_v56, %v2555_v1  ;;  %v3250_v1 = vld [vmem:[#allocation7_spill] sm:$0xff]  ;;  %v3268_v2 = vld [vmem:[#allocation8_spill] sm:$0xff] }
  0x75   : >> { %v754_v40 = vmul.f32 %v1663_v49, %v2461_v44  ;;  %v755_v51 = vmul.f32 %v1663_v49, %v2463_v45  ;;  %v3247_v57 = vunpack.c.l.bf16 %v2433_v26  ;;  %v757_v39 = vmul.f32 %v2140_v10, %v1663_v49  ;;  %v3252_v44 = vld [vmem:[#allocation9_spill] sm:$0xff]  ;;  %v3253_v45 = vld [vmem:[#allocation10_spill] sm:$0xff] }
  0x76   : >> { %v758_v3 = vmul.f32 %v3206_v25, %v1663_v49  ;;  %v3248_v4 = vunpack.c.l.bf16 %v2436_v5  ;;  %v760_v23 = vmul.f32 %v1663_v49, %v2473_v50  ;;  %v761_v11 = vmul.f32 %v1663_v49, %v3249_v13  ;;  %v3254_v26 = vld [vmem:[#allocation6_spill] sm:$0xff]  ;;  %v3258_v5 = vld [vmem:[#allocation13_spill] sm:$0xff] }
  0x77   : >> { %v756_v17 = vmul.f32 %v1663_v49, %v3247_v57  ;;  %v3251_v28 = vunpack.c.l.bf16 %v3250_v1  ;;  %v763_v18 = vmul.f32 %v3252_v44, %v1663_v49  ;;  %v764_v60 = vmul.f32 %v3253_v45, %v1663_v49  ;;  %v3260_v50 = vld [vmem:[#allocation17_spill] sm:$0xff]  ;;  %v3269_v57 = vld [vmem:[#allocation11_spill] sm:$0xff] }
  0x78   : >> { %v759_v35 = vmul.f32 %v1663_v49, %v3248_v4  ;;  %v3255_v19 = vunpack.c.l.bf16 %v3254_v26  ;;  %v766_v61 = vmul.f32 %v1663_v49, %v3256_v33  ;;  %v767_v0 = vmul.f32 %v1663_v49, %v3257_v36 }
  0x79   : >> { %v762_v7 = vmul.f32 %v1663_v49, %v3251_v28  ;;  %v3259_v41 = vunpack.c.l.bf16 %v3258_v5  ;;  %v769_v6 = vmul.f32 %v3260_v50, %v1663_v49  ;;  %v770_v14 = vmul.f32 %v3261_v9, %v1663_v49 }
  0x7a   : >> { %v765_v20 = vmul.f32 %v1663_v49, %v3255_v19  ;;  %v3263_v42 = vunpack.c.l.bf16 %v3262_v58  ;;  %v772_v62 = vmul.f32 %v1663_v49, %v3264_v55  ;;  %v773_v24 = vmul.f32 %v1663_v49, %v3265_v31 }
  0x7b   : >> { %v768_v15 = vmul.f32 %v1663_v49, %v3259_v41  ;;  %v3267_v46 = vunpack.c.l.bf16 %v3266_v12  ;;  %v775_v56 = vmul.f32 %v3268_v2, %v1663_v49  ;;  %v776_v4 = vmul.f32 %v3269_v57, %v1663_v49 }
  0x7c   : >> { %v771_v52 = vmul.f32 %v1663_v49, %v3263_v42  ;;  %v3270_v13 = vunpack.c.l.bf16 %v2469_v47  ;;  %v802_v28 = vrot.slane %v754_v40, 2  ;;  %v803_v26 = vrot.slane %v755_v51, 2 }
  0x7d   : >> { %v774_v59 = vmul.f32 %v1663_v49, %v3267_v46  ;;  %v805_v19 = vrot.slane %v756_v17, 2  ;;  %v807_v33 = vrot.slane %v757_v39, 2  ;;  %v808_v36 = vrot.slane %v758_v3, 2 }
  0x7e   : >> { %v777_v1 = vmul.f32 %v1663_v49, %v3270_v13  ;;  %v810_v5 = vrot.slane %v759_v35, 2  ;;  %v804_v41 = vsel %vm461_vm1, %v802_v28, %v803_v26  ;;  %v812_v58 = vrot.slane %v760_v23, 2 }
  0x7f   : >> { %v813_v42 = vrot.slane %v761_v11, 2  ;;  %v815_v55 = vrot.slane %v762_v7, 2  ;;  %v806_v31 = vsel %vm461_vm1, %v803_v26, %v805_v19  ;;  %v809_v12 = vsel %vm461_vm1, %v807_v33, %v808_v36 }
  0x80   : >> { %v811_v46 = vsel %vm461_vm1, %v808_v36, %v810_v5  ;;  %v817_v57 = vrot.slane %v763_v18, 2  ;;  %v818_v40 = vrot.slane %v764_v60, 2  ;;  %v820_v51 = vrot.slane %v765_v20, 2 }
  0x81   : >> { %v814_v47 = vsel %vm461_vm1, %v812_v58, %v813_v42  ;;  %v816_v49 = vsel %vm461_vm1, %v813_v42, %v815_v55  ;;  %v822_v17 = vrot.slane %v766_v61, 2  ;;  %v823_v39 = vrot.slane %v767_v0, 2  ;;  %v2738_v55 = vld [vmem:[%s2119_s9 + $0x44] sm:$0x1] }
  0x82   : >> { %v825_v3 = vrot.slane %v768_v15, 2  ;;  %v827_v35 = vrot.slane %v769_v6, 2  ;;  %v819_v23 = vsel %vm461_vm1, %v817_v57, %v818_v40  ;;  %v821_v11 = vsel %vm461_vm1, %v818_v40, %v820_v51  ;;  %3272 = vst [vmem:[#allocation7_spill] sm:$0xff] %v2738_v55 }
  0x83   : >> { %v828_v7 = vrot.slane %v770_v14, 2  ;;  %v830_v13 = vrot.slane %v771_v52, 2  ;;  %v824_v28 = vsel %vm461_vm1, %v822_v17, %v823_v39  ;;  %v832_v26 = vrot.slane %v772_v62, 2 }
  0x84   : >> { %v826_v18 = vsel %vm461_vm1, %v823_v39, %v825_v3  ;;  %v833_v19 = vrot.slane %v773_v24, 2  ;;  %v835_v20 = vrot.slane %v774_v59, 2  ;;  %v837_v61 = vrot.slane %v775_v56, 2 }
  0x85   : >> { %v829_v33 = vsel %vm461_vm1, %v827_v35, %v828_v7  ;;  %v831_v60 = vsel %vm461_vm1, %v828_v7, %v830_v13  ;;  %v838_v15 = vrot.slane %v776_v4, 2  ;;  %v840_v6 = vrot.slane %v777_v1, 2  ;;  %v2719_v1 = vld [vmem:[%s2119_s9 + $0x20] sm:$0x1] }
  0x86   : >> { %v834_v0 = vsel %vm461_vm1, %v832_v26, %v833_v19  ;;  %v2702_v14 = vadd.f32 %v804_v41, %v2603_v16  ;;  %v836_v52 = vsel %vm461_vm1, %v833_v19, %v835_v20  ;;  %v2706_v62 = vadd.f32 %v806_v31, %v2607_v63  ;;  %v1669_v63 = vld [vmem:[%s2119_s9 + $0x24] sm:$0xff]   ;;  %v2727_v41 = vld [vmem:[%s2119_s9 + $0x2c] sm:$0x1]  ;;  %v1681_v31 = vld [vmem:[%s2119_s9 + $0x54] sm:$0xff]  }
  0x87   : >> { %v2709_v24 = vadd.f32 %v809_v12, %v2610_v38  ;;  %v2712_v59 = vadd.f32 %v811_v46, %v2613_v43  ;;  %v839_v56 = vsel %vm461_vm1, %v837_v61, %v838_v15  ;;  %v841_v57 = vsel %vm461_vm1, %v838_v15, %v840_v6  ;;  %v2747_v46 = vld [vmem:[%s2119_s9 + $0x5c] sm:$0x1] }
  0x88   : >> { %v862_v16 = vadd.f32 %v814_v47, %v2618_v22  ;;  %v863_v4 = vadd.f32 %v816_v49, %v2621_v27  ;;  %v864_v38 = vadd.f32 %v819_v23, %v2627_v8  ;;  %v865_v43 = vadd.f32 %v821_v11, %v2630_v34  ;;  %v2730_v22 = vld [vmem:[%s2119_s9 + $0x38] sm:$0x1]  ;;  %v1675_v27 = vld [vmem:[%s2119_s9 + $0x3c] sm:$0xff]   ;;  %3274 = vst [vmem:[#allocation6_spill] sm:$0xff] %v2747_v46  ;;  %v2750_v47 = vld [vmem:[%s2119_s9 + $0x68] sm:$0x1] }
  0x89   : >> { %v866_v36 = vadd.f32 %v824_v28, %v2633_v21  ;;  %v867_v5 = vadd.f32 %v826_v18, %v2636_v30  ;;  %3271 = vst [vmem:[#allocation19_spill] sm:$0xff] %v2730_v22  ;;  %v868_v58 = vadd.f32 %v829_v33, %v2639_v54  ;;  %v869_v42 = vadd.f32 %v831_v60, %v2642_v48  ;;  %v2741_v21 = vld [vmem:[%s2119_s9 + $0x50] sm:$0x1] }
  0x8a   : >> { %v870_v8 = vadd.f32 %v834_v0, %v2645_v37  ;;  %v871_v34 = vadd.f32 %v836_v52, %v2648_v29  ;;  %3273 = vst [vmem:[#allocation9_spill] sm:$0xff] %v2741_v21  ;;  %v872_v30 = vadd.f32 %v839_v56, %v2651_v53  ;;  %v873_v12 = vadd.f32 %v841_v57, %v2654_v32  ;;  %v1687_v54 = vld [vmem:[%s2119_s9 + $0x6c] sm:$0xff]   ;;  %v2757_v37 = vld [vmem:[%s2119_s9 + $0x74] sm:$0x1]  ;;  %v1691_v32 = vld [vmem:[%s3119_s1 + $0x8] ss:$0 sm:$0xff] }
  0x8b   : >> { %3275 = vst [vmem:[#allocation12_spill] sm:$0xff] %v2750_v47  ;;  %v2754_v49 = vunpack.c.l.bf16 %v1669_v63  ;;  %v2759_v29 = vunpack.c.h.bf16 %v1669_v63  ;;  %v2763_v53 = vunpack.c.l.bf16 %v1675_v27  ;;  %v2768_v17 = vunpack.c.h.bf16 %v1675_v27  ;;  %v3282_v27 = vld [vmem:[#allocation11_spill] sm:$0xff]  ;;  %s1940_s9 = scalar_lea.vmem (%p188_p12), %s1939_s11, 8192 }
  0x8c   : >> { %v2772_v35 = vunpack.c.l.bf16 %v1681_v31  ;;  %v2774_v23 = vunpack.c.h.bf16 %v1681_v31  ;;  %v2778_v13 = vunpack.c.l.bf16 %v1687_v54  ;;  %v2780_v28 = vunpack.c.h.bf16 %v1687_v54  ;;  %p1942_p3 = scmp.lt.s32.totalorder (%p188_p12), %s1940_s9, %s1934_s5 }
  0x8d   : >> { %3276 = vst [vmem:[#allocation14_spill] sm:$0xff] %v2763_v53  ;;  %3277 = vst [vmem:[#allocation13_spill] sm:$0xff] %v2768_v17  ;;  %v932_v26 = vmul.f32 %v2140_v10, %v1691_v32  ;;  %v933_v19 = vmul.f32 %v3206_v25, %v1691_v32  ;;  %v934_v33 = vmul.f32 %v1691_v32, %v2754_v49 }
  0x8e   : >> { %3278 = vst [vmem:[#allocation15_spill] sm:$0xff] %v2772_v35  ;;  %3279 = vst [vmem:[#allocation20_spill] sm:$0xff] %v2774_v23  ;;  %v935_v60 = vmul.f32 %v1691_v32, %v2759_v29  ;;  %v936_v20 = vmul.f32 %v3252_v44, %v1691_v32  ;;  %v937_v61 = vmul.f32 %v3253_v45, %v1691_v32  ;;  %p1943_p5 = por (%p188_p12), %p1942_p3, %p1941_p2 }
  0x8f   : >> { %3280 = vst [vmem:[#allocation21_spill] sm:$0xff] %v2778_v13  ;;  %3281 = vst [vmem:[#allocation16_spill] sm:$0xff] %v2780_v28  ;;  %v938_v0 = vmul.f32 %v1691_v32, %v2763_v53  ;;  %v939_v15 = vmul.f32 %v1691_v32, %v2768_v17  ;;  %v940_v6 = vmul.f32 %v3260_v50, %v1691_v32 }
  0x90   : >> { %v941_v52 = vmul.f32 %v3261_v9, %v1691_v32  ;;  %v942_v56 = vmul.f32 %v1691_v32, %v2772_v35  ;;  %v943_v57 = vmul.f32 %v1691_v32, %v2774_v23  ;;  %v944_v63 = vmul.f32 %v3268_v2, %v1691_v32  ;;  %p1944_p6 = pnand (%p188_p12), %p1943_p5, %p1937_p1 }
  0x91   : >> { %v945_v31 = vmul.f32 %v3282_v27, %v1691_v32  ;;  %v946_v54 = vmul.f32 %v1691_v32, %v2778_v13  ;;  %v947_v18 = vmul.f32 %v1691_v32, %v2780_v28  ;;  %v2800_v7 = vadd.f32 %v932_v26, %v2702_v14  ;;  %v1693_v32 = vld [vmem:[%s3119_s1 + $0x9] ss:$0 sm:$0xff] }
  0x92   : >> { %v2803_v11 = vadd.f32 %v933_v19, %v2706_v62  ;;  %v2806_v3 = vadd.f32 %v934_v33, %v2709_v24  ;;  %v2809_v39 = vadd.f32 %v935_v60, %v2712_v59  ;;  %v2811_v51 = vadd.f32 %v936_v20, %v862_v16 }
  0x93   : >> { %v2813_v40 = vadd.f32 %v937_v61, %v863_v4  ;;  %v2818_v48 = vadd.f32 %v938_v0, %v864_v38  ;;  %v2820_v14 = vadd.f32 %v939_v15, %v865_v43  ;;  %v2822_v62 = vadd.f32 %v940_v6, %v866_v36 }
  0x94   : >> { %v2824_v26 = vadd.f32 %v941_v52, %v867_v5  ;;  %v2826_v24 = vadd.f32 %v942_v56, %v868_v58  ;;  %v2828_v59 = vadd.f32 %v943_v57, %v869_v42  ;;  %v2830_v16 = vadd.f32 %v944_v63, %v870_v8 }
  0x95   : >> { %v2832_v4 = vadd.f32 %v945_v31, %v871_v34  ;;  %v2834_v19 = vadd.f32 %v946_v54, %v872_v30  ;;  %v2836_v33 = vadd.f32 %v947_v18, %v873_v12  ;;  %v969_v38 = vmul.f32 %v2140_v10, %v1693_v32 }
  0x96   : >> { %v970_v43 = vmul.f32 %v3206_v25, %v1693_v32  ;;  %v3283_v36 = vunpack.c.l.bf16 %v2719_v1  ;;  %v972_v58 = vmul.f32 %v1693_v32, %v2754_v49  ;;  %v973_v42 = vmul.f32 %v1693_v32, %v2759_v29 }
  0x97   : >> { %v3284_v8 = vunpack.c.l.bf16 %v2727_v41  ;;  %v975_v34 = vmul.f32 %v3252_v44, %v1693_v32  ;;  %v976_v30 = vmul.f32 %v3253_v45, %v1693_v32  ;;  %v3285_v12 = vunpack.c.l.bf16 %v2730_v22 }
  0x98   : >> { %v971_v5 = vmul.f32 %v1693_v32, %v3283_v36  ;;  %v978_v20 = vmul.f32 %v1693_v32, %v2763_v53  ;;  %v979_v61 = vmul.f32 %v1693_v32, %v2768_v17  ;;  %v3286_v0 = vunpack.c.l.bf16 %v2738_v55 }
  0x99   : >> { %v974_v60 = vmul.f32 %v1693_v32, %v3284_v8  ;;  %v977_v18 = vmul.f32 %v1693_v32, %v3285_v12  ;;  %v981_v6 = vmul.f32 %v3260_v50, %v1693_v32  ;;  %v982_v52 = vmul.f32 %v3261_v9, %v1693_v32 }
  0x9a   : >> { %v980_v15 = vmul.f32 %v1693_v32, %v3286_v0  ;;  %v3287_v56 = vunpack.c.l.bf16 %v2741_v21  ;;  %v984_v63 = vmul.f32 %v1693_v32, %v2772_v35  ;;  %v985_v31 = vmul.f32 %v1693_v32, %v2774_v23 }
  0x9b   : >> { %v3288_v54 = vunpack.c.l.bf16 %v2747_v46  ;;  %v987_v8 = vmul.f32 %v3268_v2, %v1693_v32  ;;  %v988_v12 = vmul.f32 %v3282_v27, %v1693_v32  ;;  %v3289_v0 = vunpack.c.l.bf16 %v2750_v47 }
  0x9c   : >> { %v983_v57 = vmul.f32 %v1693_v32, %v3287_v56  ;;  %v990_v50 = vmul.f32 %v1693_v32, %v2778_v13  ;;  %v991_v9 = vmul.f32 %v1693_v32, %v2780_v28  ;;  %v3290_v56 = vunpack.c.l.bf16 %v2757_v37 }
  0x9d   : >> { %v986_v36 = vmul.f32 %v1693_v32, %v3288_v54  ;;  %v989_v55 = vmul.f32 %v1693_v32, %v3289_v0  ;;  %v1017_v35 = vrot.slane %v969_v38, 1  ;;  %v1018_v17 = vrot.slane %v970_v43, 1 }
  0x9e   : >> { %v992_v21 = vmul.f32 %v1693_v32, %v3290_v56  ;;  %v1020_v23 = vrot.slane %v971_v5, 1  ;;  %v1022_v53 = vrot.slane %v972_v58, 1  ;;  %v1023_v46 = vrot.slane %v973_v42, 1  ;;  %v3293_v56 = vld [vmem:[#allocation10_spill] sm:$0xff] }
  0x9f   : >> { %v1025_v54 = vrot.slane %v974_v60, 1  ;;  %v1019_v2 = vsel %vm335_vm0, %v1017_v35, %v1018_v17  ;;  %v1027_v22 = vrot.slane %v975_v34, 1  ;;  %v1028_v27 = vrot.slane %v976_v30, 1 }
  0xa0   : >> { %v1030_v45 = vrot.slane %v977_v18, 1  ;;  %v1021_v0 = vsel %vm335_vm0, %v1018_v17, %v1020_v23  ;;  %v1024_v13 = vsel %vm335_vm0, %v1022_v53, %v1023_v46  ;;  %v1032_v47 = vrot.slane %v978_v20, 1 }
  0xa1   : >> { %v1026_v28 = vsel %vm335_vm0, %v1023_v46, %v1025_v54  ;;  %v1029_v32 = vsel %vm335_vm0, %v1027_v22, %v1028_v27  ;;  %v1033_v43 = vrot.slane %v979_v61, 1  ;;  %v1035_v5 = vrot.slane %v980_v15, 1 }
  0xa2   : >> { %v1031_v38 = vsel %vm335_vm0, %v1028_v27, %v1030_v45  ;;  %v1037_v58 = vrot.slane %v981_v6, 1  ;;  %v1038_v42 = vrot.slane %v982_v52, 1  ;;  %v1040_v60 = vrot.slane %v983_v57, 1 }
  0xa3   : >> { %v1042_v35 = vrot.slane %v984_v63, 1  ;;  %v1034_v34 = vsel %vm335_vm0, %v1032_v47, %v1033_v43  ;;  %v1036_v30 = vsel %vm335_vm0, %v1033_v43, %v1035_v5  ;;  %v1043_v17 = vrot.slane %v985_v31, 1 }
  0xa4   : >> { %v1045_v23 = vrot.slane %v986_v36, 1  ;;  %v1039_v53 = vsel %vm335_vm0, %v1037_v58, %v1038_v42  ;;  %v1041_v46 = vsel %vm335_vm0, %v1038_v42, %v1040_v60  ;;  %v1047_v18 = vrot.slane %v987_v8, 1 }
  0xa5   : >> { %v1048_v22 = vrot.slane %v988_v12, 1  ;;  %v1044_v45 = vsel %vm335_vm0, %v1042_v35, %v1043_v17  ;;  %v1050_v20 = vrot.slane %v989_v55, 1  ;;  %v1052_v61 = vrot.slane %v990_v50, 1 }
  0xa6   : >> { %v1046_v27 = vsel %vm335_vm0, %v1043_v17, %v1045_v23  ;;  %v1053_v6 = vrot.slane %v991_v9, 1  ;;  %v1055_v47 = vrot.slane %v992_v21, 1  ;;  %v2884_v52 = vadd.f32 %v1019_v2, %v2800_v7  ;;  %v1695_v21 = vld [vmem:[%s3119_s1 + $0xa] ss:$0 sm:$0xff]  ;;  %v3305_v17 = vld [vmem:[#allocation20_spill] sm:$0xff] }
  0xa7   : >> { %v1049_v15 = vsel %vm335_vm0, %v1047_v18, %v1048_v22  ;;  %v1051_v57 = vsel %vm335_vm0, %v1048_v22, %v1050_v20  ;;  %v2888_v63 = vadd.f32 %v1021_v0, %v2803_v11  ;;  %v2891_v31 = vadd.f32 %v1024_v13, %v2806_v3  ;;  %v3308_v22 = vld [vmem:[#allocation8_spill] sm:$0xff] }
  0xa8   : >> { %v2894_v36 = vadd.f32 %v1026_v28, %v2809_v39  ;;  %v1054_v50 = vsel %vm335_vm0, %v1052_v61, %v1053_v6  ;;  %v1056_v55 = vsel %vm335_vm0, %v1053_v6, %v1055_v47  ;;  %v2899_v9 = vadd.f32 %v1029_v32, %v2811_v51  ;;  %v3310_v61 = vld [vmem:[#allocation12_spill] sm:$0xff]  ;;  %v3312_v47 = vld [vmem:[#allocation21_spill] sm:$0xff] }
  0xa9   : >> { %v2902_v2 = vadd.f32 %v1031_v38, %v2813_v40  ;;  %v2908_v3 = vadd.f32 %v1034_v34, %v2818_v48  ;;  %v2911_v39 = vadd.f32 %v1036_v30, %v2820_v14  ;;  %v2914_v11 = vadd.f32 %v1039_v53, %v2822_v62  ;;  %v3306_v53 = vld [vmem:[#allocation6_spill] sm:$0xff] }
  0xaa   : >> { %v2917_v7 = vadd.f32 %v1041_v46, %v2824_v26  ;;  %v2920_v51 = vadd.f32 %v1044_v45, %v2826_v24  ;;  %v2923_v40 = vadd.f32 %v1046_v27, %v2828_v59  ;;  %v2926_v13 = vadd.f32 %v1049_v15, %v2830_v16  ;;  %v3309_v27 = vld [vmem:[#allocation11_spill] sm:$0xff] }
  0xab   : >> { %v2929_v48 = vadd.f32 %v1051_v57, %v2832_v4  ;;  %v2932_v28 = vadd.f32 %v1054_v50, %v2834_v19  ;;  %v2935_v14 = vadd.f32 %v1056_v55, %v2836_v33  ;;  %v1094_v62 = vmul.f32 %v2140_v10, %v1695_v21  ;;  %v3294_v33 = vld [vmem:[#allocation19_spill] sm:$0xff]  ;;  %v3296_v10 = vld [vmem:[#allocation14_spill] sm:$0xff]  ;;  %v3313_v50 = vld [vmem:[#allocation16_spill] sm:$0xff] }
  0xac   : >> { %v1095_v26 = vmul.f32 %v3206_v25, %v1695_v21  ;;  %v3291_v24 = vunpack.c.l.bf16 %v2719_v1  ;;  %v1097_v8 = vmul.f32 %v1695_v21, %v2754_v49  ;;  %v1098_v16 = vmul.f32 %v1695_v21, %v2759_v29  ;;  %v3297_v25 = vld [vmem:[#allocation13_spill] sm:$0xff]  ;;  %v3298_v1 = vld [vmem:[#allocation7_spill] sm:$0xff]  ;;  %v3301_v29 = vld [vmem:[#allocation18_spill] sm:$0xff] }
  0xad   : >> { %v3292_v4 = vunpack.c.l.bf16 %v2727_v41  ;;  %v1100_v19 = vmul.f32 %v3252_v44, %v1695_v21  ;;  %v1101_v54 = vmul.f32 %v3293_v56, %v1695_v21  ;;  %v3295_v0 = vunpack.c.l.bf16 %v3294_v33  ;;  %v3300_v49 = vld [vmem:[#allocation17_spill] sm:$0xff]  ;;  %v3304_v44 = vld [vmem:[#allocation15_spill] sm:$0xff] }
  0xae   : >> { %v1096_v59 = vmul.f32 %v1695_v21, %v3291_v24  ;;  %v1103_v38 = vmul.f32 %v1695_v21, %v3296_v10  ;;  %v1104_v43 = vmul.f32 %v1695_v21, %v3297_v25  ;;  %v3299_v5 = vunpack.c.l.bf16 %v3298_v1  ;;  %v3302_v41 = vld [vmem:[#allocation9_spill] sm:$0xff] }
  0xaf   : >> { %v1099_v12 = vmul.f32 %v1695_v21, %v3292_v4  ;;  %v1102_v32 = vmul.f32 %v1695_v21, %v3295_v0  ;;  %v1106_v42 = vmul.f32 %v3300_v49, %v1695_v21  ;;  %v1107_v60 = vmul.f32 %v3301_v29, %v1695_v21 }
  0xb0   : >> { %v1105_v58 = vmul.f32 %v1695_v21, %v3299_v5  ;;  %v3303_v35 = vunpack.c.l.bf16 %v3302_v41  ;;  %v1109_v30 = vmul.f32 %v1695_v21, %v3304_v44  ;;  %v1110_v23 = vmul.f32 %v1695_v21, %v3305_v17 }
  0xb1   : >> { %v3307_v46 = vunpack.c.l.bf16 %v3306_v53  ;;  %v1112_v45 = vmul.f32 %v3308_v22, %v1695_v21  ;;  %v1113_v20 = vmul.f32 %v3309_v27, %v1695_v21  ;;  %v3311_v15 = vunpack.c.l.bf16 %v3310_v61 }
  0xb2   : >> { %v1108_v34 = vmul.f32 %v1695_v21, %v3303_v35  ;;  %v1115_v57 = vmul.f32 %v1695_v21, %v3312_v47  ;;  %v1116_v55 = vmul.f32 %v1695_v21, %v3313_v50  ;;  %v3314_v24 = vunpack.c.l.bf16 %v2757_v37 }
  0xb3   : >> { %v1111_v18 = vmul.f32 %v1695_v21, %v3307_v46  ;;  %v1114_v6 = vmul.f32 %v1695_v21, %v3311_v15  ;;  %v1142_v56 = vrot.slane %v1094_v62, 2  ;;  %v1143_v33 = vrot.slane %v1095_v26, 2 }
  0xb4   : >> { %v1117_v4 = vmul.f32 %v1695_v21, %v3314_v24  ;;  %v1145_v0 = vrot.slane %v1096_v59, 2  ;;  %v1147_v10 = vrot.slane %v1097_v8, 2  ;;  %v1148_v25 = vrot.slane %v1098_v16, 2 }
  0xb5   : >> { %v1150_v1 = vrot.slane %v1099_v12, 2  ;;  %v1144_v5 = vsel %vm461_vm1, %v1142_v56, %v1143_v33  ;;  %v1152_v49 = vrot.slane %v1100_v19, 2  ;;  %v1153_v29 = vrot.slane %v1101_v54, 2 }
  0xb6   : >> { %v1155_v41 = vrot.slane %v1102_v32, 2  ;;  %v1146_v35 = vsel %vm461_vm1, %v1143_v33, %v1145_v0  ;;  %v1149_v44 = vsel %vm461_vm1, %v1147_v10, %v1148_v25  ;;  %v1157_v53 = vrot.slane %v1103_v38, 2 }
  0xb7   : >> { %v1151_v17 = vsel %vm461_vm1, %v1148_v25, %v1150_v1  ;;  %v1154_v37 = vsel %vm461_vm1, %v1152_v49, %v1153_v29  ;;  %v1158_v62 = vrot.slane %v1104_v43, 2  ;;  %v1160_v26 = vrot.slane %v1105_v58, 2  ;;  %v1931_v49 = vld [vmem:[%s3120_s2 + $0x28] sm:$0xff] (%p188_p12)  }
  0xb8   : >> { %v1156_v21 = vsel %vm461_vm1, %v1153_v29, %v1155_v41  ;;  %v1162_v59 = vrot.slane %v1106_v42, 2  ;;  %v1163_v8 = vrot.slane %v1107_v60, 2  ;;  %v1165_v16 = vrot.slane %v1108_v34, 2  ;;  %v1932_v29 = vld [vmem:[%s3120_s2 + $0x30] sm:$0xff] (%p188_p12)   ;;  %v1933_v41 = vld [vmem:[%s3120_s2 + $0x38] sm:$0xff] (%p188_p12)  }
  0xb9   : >> { %v1167_v12 = vrot.slane %v1109_v30, 2  ;;  %v1159_v19 = vsel %vm461_vm1, %v1157_v53, %v1158_v62  ;;  %v1161_v54 = vsel %vm461_vm1, %v1158_v62, %v1160_v26  ;;  %v1168_v32 = vrot.slane %v1110_v23, 2 }
  0xba   : >> { %v1170_v46 = vrot.slane %v1111_v18, 2  ;;  %v1164_v22 = vsel %vm461_vm1, %v1162_v59, %v1163_v8  ;;  %v1166_v38 = vsel %vm461_vm1, %v1163_v8, %v1165_v16  ;;  %v1172_v27 = vrot.slane %v1112_v45, 2 }
  0xbb   : >> { %v1173_v61 = vrot.slane %v1113_v20, 2  ;;  %v1169_v43 = vsel %vm461_vm1, %v1167_v12, %v1168_v32  ;;  %v1175_v42 = vrot.slane %v1114_v6, 2  ;;  %v1177_v60 = vrot.slane %v1115_v57, 2 }
  0xbc   : >> { %v1171_v58 = vsel %vm461_vm1, %v1168_v32, %v1170_v46  ;;  %v1178_v30 = vrot.slane %v1116_v55, 2  ;;  %v1180_v15 = vrot.slane %v1117_v4, 2  ;;  %v1198_v23 = vadd.f32 %v1144_v5, %v2884_v52  ;;  %v1930_v5 = vld [vmem:[%s3120_s2 + $0x20] sm:$0xff] (%p188_p12)  }
  0xbd   : >> { %v1174_v34 = vsel %vm461_vm1, %v1172_v27, %v1173_v61  ;;  %v1176_v18 = vsel %vm461_vm1, %v1173_v61, %v1175_v42  ;;  %v1199_v47 = vadd.f32 %v1146_v35, %v2888_v63  ;;  %v1200_v50 = vadd.f32 %v1149_v44, %v2891_v31 }
  0xbe   : >> { %v1201_v45 = vadd.f32 %v1151_v17, %v2894_v36  ;;  %v1179_v20 = vsel %vm461_vm1, %v1177_v60, %v1178_v30  ;;  %v1181_v6 = vsel %vm461_vm1, %v1178_v30, %v1180_v15  ;;  %v1202_v57 = vadd.f32 %v1154_v37, %v2899_v9 }
  0xbf   : >> { %v1203_v55 = vadd.f32 %v1156_v21, %v2902_v2  ;;  %v1204_v24 = vadd.f32 %v1159_v19, %v2908_v3  ;;  %v1205_v52 = vadd.f32 %v1161_v54, %v2911_v39  ;;  %v1206_v4 = vadd.f32 %v1164_v22, %v2914_v11 }
  0xc0   : >> { %v1207_v63 = vadd.f32 %v1166_v38, %v2917_v7  ;;  %v1208_v31 = vadd.f32 %v1169_v43, %v2920_v51  ;;  %v1209_v36 = vadd.f32 %v1171_v58, %v2923_v40  ;;  %v1210_v56 = vadd.f32 %v1174_v34, %v2926_v13  ;;  %v1926_v51 = vld [vmem:[%s3120_s2] sm:$0xff] (%p188_p12)   ;;  %v1927_v40 = vld [vmem:[%s3120_s2 + $0x8] sm:$0xff] (%p188_p12)   ;;  %v1928_v13 = vld [vmem:[%s3120_s2 + $0x10] sm:$0xff] (%p188_p12)  }
  0xc1   : >> { %v1211_v33 = vadd.f32 %v1176_v18, %v2929_v48  ;;  %v1212_v9 = vadd.f32 %v1179_v20, %v2932_v28  ;;  %v1213_v2 = vadd.f32 %v1181_v6, %v2935_v14  ;;  %v1214_v0 = vpack.c.bf16 %v1199_v47, %v1198_v23  ;;  %190 = sbr.rel (!%p188_p12) target bundleno = 27 (0x1b), region = 80  ;;  %1796 = vmatprep.subr.bf16.mxu0 (%p188_p12), %v1926_v51  ;;  %v1929_v48 = vld [vmem:[%s3120_s2 + $0x18] sm:$0xff] (%p188_p12)  }
  0xc2   : >> { %v1215_v3 = vpack.c.bf16 %v1201_v45, %v1200_v50  ;;  %v1216_v10 = vpack.c.bf16 %v1203_v55, %v1202_v57  ;;  %v1217_v39 = vpack.c.bf16 %v1205_v52, %v1204_v24  ;;  %v1218_v25 = vpack.c.bf16 %v1207_v63, %v1206_v4  ;;  %1844 = vmatprep.subr.bf16.mxu1 (%p188_p12), %v1926_v51 }
  0xc3   : >> { %v1219_v11 = vpack.c.bf16 %v1209_v36, %v1208_v31  ;;  %v1220_v1 = vpack.c.bf16 %v1211_v33, %v1210_v56  ;;  %v1221_v7 = vpack.c.bf16 %v1213_v2, %v1212_v9  ;;  %1224 = vst [vmem:[%s1223_s27] sm:$0xff] %v1214_v0  ;;  %1797 = vmatpush3.bf16.msra.mxu0 (%p188_p12), %v1926_v51 }
  0xc4   : >> { %1225 = vst [vmem:[%s1223_s27 + $0x8] sm:$0xff] %v1215_v3  ;;  %1226 = vst [vmem:[%s1223_s27 + $0x10] sm:$0xff] %v1216_v10  ;;  %1852 = vmatpush3.bf16.msra.mxu1 (%p188_p12), %v1926_v51  ;;  %1798 = vmatprep.subr.bf16.mxu0 (%p188_p12), %v1927_v40 }
  0xc5   : >> { %1227 = vst [vmem:[%s1223_s27 + $0x18] sm:$0xff] %v1217_v39  ;;  %1228 = vst [vmem:[%s1223_s27 + $0x20] sm:$0xff] %v1218_v25  ;;  %1845 = vmatprep.subr.bf16.mxu1 (%p188_p12), %v1927_v40 }
  0xc6   : >> { %1229 = vst [vmem:[%s1223_s27 + $0x28] sm:$0xff] %v1219_v11  ;;  %1230 = vst [vmem:[%s1223_s27 + $0x30] sm:$0xff] %v1220_v1 }
  0xc7   : >> { %1231 = vst [vmem:[%s1223_s27 + $0x38] sm:$0xff] %v1221_v7  ;;  %1799 = vmatpush3.bf16.msra.mxu0 (%p188_p12), %v1927_v40 }
  0xc8   : > { %1853 = vmatpush3.bf16.msra.mxu1 %v1927_v40  ;;  %1800 = vmatprep.subr.bf16.mxu0 %v1928_v13 }
  0xc9   : > { %1846 = vmatprep.subr.bf16.mxu1 %v1928_v13 }
  0xcb   : > { %1801 = vmatpush3.bf16.msra.mxu0 %v1928_v13 }
  0xcc   : > { %1854 = vmatpush3.bf16.msra.mxu1 %v1928_v13  ;;  %1802 = vmatprep.subr.bf16.mxu0 %v1929_v48 }
  0xcd   : > { %1847 = vmatprep.subr.bf16.mxu1 %v1929_v48 }
  0xce   : > { %v1232_v28 = vld [vmem:[#allocation2] sm:$0xff]  ;;  %v1233_v35 = vld [vmem:[#allocation2 + $0x8] sm:$0xff]  ;;  %v1234_v17 = vld [vmem:[#allocation2 + $0x10] sm:$0xff] }
  0xcf   : > { %v1240_v14 = vld [vmem:[#allocation2 + $0x40] sm:$0xff]  ;;  %1812 = vmatprep.mubr.bf16.mxu0 %v1232_v28  ;;  %1803 = vmatpush3.bf16.msra.mxu0 %v1929_v48  ;;  %v1241_v44 = vld [vmem:[#allocation2 + $0x48] sm:$0xff]  ;;  %v1242_v53 = vld [vmem:[#allocation2 + $0x50] sm:$0xff] }
  0xd0   : > { %1828 = vmatprep.mubr.bf16.mxu1 %v1240_v14  ;;  %1855 = vmatpush3.bf16.msra.mxu1 %v1929_v48  ;;  %v1235_v37 = vld [vmem:[#allocation2 + $0x18] sm:$0xff]  ;;  %v1236_v62 = vld [vmem:[#allocation2 + $0x20] sm:$0xff]  ;;  %v1237_v59 = vld [vmem:[#allocation2 + $0x28] sm:$0xff] }
  0xd1   : > { %1804 = vmatprep.subr.bf16.mxu0 %v1930_v5  ;;  %1848 = vmatprep.subr.bf16.mxu1 %v1930_v5  ;;  %v1243_v21 = vld [vmem:[#allocation2 + $0x58] sm:$0xff]  ;;  %v1244_v26 = vld [vmem:[#allocation2 + $0x60] sm:$0xff]  ;;  %v1245_v8 = vld [vmem:[#allocation2 + $0x68] sm:$0xff] }
  0xd2   : > { %v1238_v16 = vld [vmem:[#allocation2 + $0x30] sm:$0xff]  ;;  %v1239_v19 = vld [vmem:[#allocation2 + $0x38] sm:$0xff] }
  0xd3   : > { %1805 = vmatpush3.bf16.msra.mxu0 %v1930_v5  ;;  %v1246_v12 = vld [vmem:[#allocation2 + $0x70] sm:$0xff]  ;;  %v1247_v54 = vld [vmem:[#allocation2 + $0x78] sm:$0xff] }
  0xd4   : > { %1856 = vmatpush3.bf16.msra.mxu1 %v1930_v5  ;;  %1806 = vmatprep.subr.bf16.mxu0 %v1931_v49 }
  0xd5   : > { %1849 = vmatprep.subr.bf16.mxu1 %v1931_v49 }
  0xd7   : > { %1807 = vmatpush3.bf16.msra.mxu0 %v1931_v49 }
  0xd8   : > { %1857 = vmatpush3.bf16.msra.mxu1 %v1931_v49  ;;  %1808 = vmatprep.subr.bf16.mxu0 %v1932_v29 }
  0xd9   : > { %1850 = vmatprep.subr.bf16.mxu1 %v1932_v29 }
  0xdb   : > { %1809 = vmatpush3.bf16.msra.mxu0 %v1932_v29 }
  0xdc   : > { %1858 = vmatpush3.bf16.msra.mxu1 %v1932_v29  ;;  %1810 = vmatprep.subr.bf16.mxu0 %v1933_v41 }
  0xdd   : > { %1851 = vmatprep.subr.bf16.mxu1 %v1933_v41 }
  0xdf   : > { %1811 = vmatpush3.bf16.msra.mxu0 %v1933_v41 }
  0xe0   : > { %1859 = vmatpush3.bf16.msra.mxu1 %v1933_v41 }
  0xe2   : > { %1813 = vmatmul.mubr.bf16.vlgmr.msra.gmra.mrb[0].mxu0 %v1233_v35 }
  0xe3   : > { %1829 = vmatmul.mubr.bf16.vlgmr.msra.gmra.mrb[0].mxu1 %v1241_v44  ;;  %1816 = vmatprep.mubr.bf16.mxu0 %v1234_v17 }
  0xe4   : > { %1832 = vmatprep.mubr.bf16.mxu1 %v1242_v53 }
  0xea   : > { %1817 = vmatmul.mubr.bf16.gmra.mrb[4].mxu0 %v1235_v37 }
  0xeb   : > { %1833 = vmatmul.mubr.bf16.gmra.mrb[4].mxu1 %v1243_v21  ;;  %1820 = vmatprep.mubr.bf16.mxu0 %v1236_v62 }
  0xec   : > { %1836 = vmatprep.mubr.bf16.mxu1 %v1244_v26 }
  0xf2   : > { %1821 = vmatmul.mubr.bf16.gmra.mrb[8].mxu0 %v1237_v59 }
  0xf3   : > { %1837 = vmatmul.mubr.bf16.gmra.mrb[8].mxu1 %v1245_v8  ;;  %1824 = vmatprep.mubr.bf16.mxu0 %v1238_v16 }
  0xf4   : > { %1840 = vmatprep.mubr.bf16.mxu1 %v1246_v12 }
  0xfa   : > { %1825 = vmatmul.mubr.bf16.gmra.mrb[12].mxu0 %v1239_v19 }
  0xfb   : > { %1841 = vmatmul.mubr.bf16.gmra.mrb[12].mxu1 %v1247_v54 }
 0x1b5   : > { %v1814_v32 = vpop.f32.mrb[0].mxu0 }
 0x1b6   : > { %v1830_v46 = vpop.f32.mrb[0].mxu1  ;;  %1475 = vst [vmem:[%s2110_s6 + $0x10] sm:$0xff] %v1814_v32  ;;  %v1346_v22 = vpop.f32.mrb[1].mxu0 }
 0x1b7   : > { %1491 = vst [vmem:[%s2110_s6 + $0x90] sm:$0xff] %v1830_v46  ;;  %v1410_v38 = vpop.f32.mrb[1].mxu1  ;;  %1473 = vst [vmem:[%s2110_s6] sm:$0xff] %v1346_v22  ;;  %v1815_v27 = vpop.f32.mrb[2].mxu0 }
 0x1b8   : > { %1489 = vst [vmem:[%s2110_s6 + $0x80] sm:$0xff] %v1410_v38  ;;  %v1831_v61 = vpop.f32.mrb[2].mxu1  ;;  %1476 = vst [vmem:[%s2110_s6 + $0x18] sm:$0xff] %v1815_v27  ;;  %v1349_v43 = vpop.f32.mrb[3].mxu0 }
 0x1b9   : > { %1492 = vst [vmem:[%s2110_s6 + $0x98] sm:$0xff] %v1831_v61  ;;  %v1413_v58 = vpop.f32.mrb[3].mxu1  ;;  %1474 = vst [vmem:[%s2110_s6 + $0x8] sm:$0xff] %v1349_v43 }
 0x1ba   : > { %1490 = vst [vmem:[%s2110_s6 + $0x88] sm:$0xff] %v1413_v58 }
 0x1bd   : > { %v1818_v42 = vpop.f32.mrb[4].mxu0 }
 0x1be   : > { %v1834_v60 = vpop.f32.mrb[4].mxu1  ;;  %1479 = vst [vmem:[%s2110_s6 + $0x30] sm:$0xff] %v1818_v42  ;;  %v1362_v34 = vpop.f32.mrb[5].mxu0 }
 0x1bf   : > { %1495 = vst [vmem:[%s2110_s6 + $0xb0] sm:$0xff] %v1834_v60  ;;  %v1426_v30 = vpop.f32.mrb[5].mxu1  ;;  %1477 = vst [vmem:[%s2110_s6 + $0x20] sm:$0xff] %v1362_v34  ;;  %v1819_v15 = vpop.f32.mrb[6].mxu0 }
 0x1c0   : > { %1493 = vst [vmem:[%s2110_s6 + $0xa0] sm:$0xff] %v1426_v30  ;;  %v1835_v23 = vpop.f32.mrb[6].mxu1  ;;  %1480 = vst [vmem:[%s2110_s6 + $0x38] sm:$0xff] %v1819_v15  ;;  %v1365_v18 = vpop.f32.mrb[7].mxu0 }
 0x1c1   : > { %1496 = vst [vmem:[%s2110_s6 + $0xb8] sm:$0xff] %v1835_v23  ;;  %v1429_v47 = vpop.f32.mrb[7].mxu1  ;;  %1478 = vst [vmem:[%s2110_s6 + $0x28] sm:$0xff] %v1365_v18 }
 0x1c2   : > { %1494 = vst [vmem:[%s2110_s6 + $0xa8] sm:$0xff] %v1429_v47 }
 0x1c5   : > { %v1822_v50 = vpop.f32.mrb[8].mxu0 }
 0x1c6   : > { %v1838_v45 = vpop.f32.mrb[8].mxu1  ;;  %1483 = vst [vmem:[%s2110_s6 + $0x50] sm:$0xff] %v1822_v50  ;;  %v1378_v20 = vpop.f32.mrb[9].mxu0 }
 0x1c7   : > { %1499 = vst [vmem:[%s2110_s6 + $0xd0] sm:$0xff] %v1838_v45  ;;  %v1442_v6 = vpop.f32.mrb[9].mxu1  ;;  %1481 = vst [vmem:[%s2110_s6 + $0x40] sm:$0xff] %v1378_v20  ;;  %v1823_v57 = vpop.f32.mrb[10].mxu0 }
 0x1c8   : > { %1497 = vst [vmem:[%s2110_s6 + $0xc0] sm:$0xff] %v1442_v6  ;;  %v1839_v55 = vpop.f32.mrb[10].mxu1  ;;  %1484 = vst [vmem:[%s2110_s6 + $0x58] sm:$0xff] %v1823_v57  ;;  %v1381_v24 = vpop.f32.mrb[11].mxu0 }
 0x1c9   : > { %1500 = vst [vmem:[%s2110_s6 + $0xd8] sm:$0xff] %v1839_v55  ;;  %v1445_v52 = vpop.f32.mrb[11].mxu1  ;;  %1482 = vst [vmem:[%s2110_s6 + $0x48] sm:$0xff] %v1381_v24 }
 0x1ca   : > { %1498 = vst [vmem:[%s2110_s6 + $0xc8] sm:$0xff] %v1445_v52 }
 0x1cd   : > { %v1826_v4 = vpop.f32.mrb[12].mxu0 }
 0x1ce   : > { %v1842_v63 = vpop.f32.mrb[12].mxu1  ;;  %1487 = vst [vmem:[%s2110_s6 + $0x70] sm:$0xff] %v1826_v4  ;;  %v1394_v31 = vpop.f32.mrb[13].mxu0 }
 0x1cf   : > { %1503 = vst [vmem:[%s2110_s6 + $0xf0] sm:$0xff] %v1842_v63  ;;  %v1458_v36 = vpop.f32.mrb[13].mxu1  ;;  %1485 = vst [vmem:[%s2110_s6 + $0x60] sm:$0xff] %v1394_v31  ;;  %v1827_v56 = vpop.f32.mrb[14].mxu0 }
 0x1d0   : > { %1501 = vst [vmem:[%s2110_s6 + $0xe0] sm:$0xff] %v1458_v36  ;;  %v1843_v33 = vpop.f32.mrb[14].mxu1  ;;  %1488 = vst [vmem:[%s2110_s6 + $0x78] sm:$0xff] %v1827_v56  ;;  %v1397_v9 = vpop.f32.mrb[15].mxu0 }
 0x1d1   : > { %1504 = vst [vmem:[%s2110_s6 + $0xf8] sm:$0xff] %v1843_v33  ;;  %v1461_v2 = vpop.f32.mrb[15].mxu1  ;;  %1486 = vst [vmem:[%s2110_s6 + $0x68] sm:$0xff] %v1397_v9 }
 0x1d2   : > { %1502 = vst [vmem:[%s2110_s6 + $0xe8] sm:$0xff] %v1461_v2 }
 0x1d3   : > { %1947 = shalt.err (!%p1944_p6)
}
 0x1d4   : > { %s1948_s26 = scalar_lea.hbm %s3060_s10, 4096  ;;  %s1952_s19 = scalar_lea.hbm %s3121_s3, 8192 }
 0x1d5   : > { %p1949_p7 = scmp.ne.s32.totalorder %s3060_s10, %s1948_s26  ;;  %p1953_p11 = scmp.lt.u32.totalorder %s3060_s10, %s3121_s3 }
 0x1d6   : > { %p1954_p12 = scmp.lt.u32.totalorder %s1952_s19, %s1948_s26  ;;  %p1956_p0 = scmp.lt.u32.totalorder %s1948_s26, %s3060_s10 }
 0x1d7   : > { %p1950_p9 = pnand %p1949_p7, %p2085_p4 }
 0x1d8   : > { %p1955_p13 = por %p1954_p12, %p1953_p11 }
 0x1d9   : > { %p1951_p10 = pneg %p1950_p9 }
 0x1da   : > { %p1957_p1 = por %p1956_p0, %p1955_p13 }
 0x1dc   : > { %p1958_p2 = pnand %p1957_p1, %p1951_p10 }
 0x1de   : > { %1961 = shalt.err (!%p1958_p2)
}
 0x1df   : > { %s2023_s27 = smov 128   ;;  %s2024_s28 = smov 8  }
 0x1e0   : > { %1861 = dma.vmem_to_hbm [thread:$0]  (%p2085_p4), %s3062_s30, 4096, %s3060_s10, %s3072_s15, %s2023_s27, %s2023_s27, %s2024_s28  }
 0x1e1 PF: > { %p1867_p3 = scmp.ge.s32.totalorder %s2016_s17, 2  ;;  %s1537_s29 = sand.u32 1, %s1996_s12  }
 0x1e2   : > { %s1538_s4 = scalar_lea.sflag [#allocation4], %s1537_s29 }
 0x1e3   : > { %p1864_p5 = pnand %p1867_p3, %p2092_p8 }
 0x1e5   : > { %1991 = dma.done.wait (!%p1864_p5), %s1538_s4, 4096  }
 0x1e6   : > { %1993 = vsyncadd (!%p1864_p5), %s1538_s4, 4294963200  ;;  %s16_s17 = sadd.s32 1, %s2016_s17   ;;  %s3315_s12 = smov %s2000_s13 }
 0x1e7   : > { %p13_p6 = scmp.ge.s32.totalorder %s16_s17, 4   ;;  %s3316_s13 = smov %s2004_s14 }
 0x1e8   : > { %s3317_s14 = smov %s2098_s25  ;;  %s3318_s15 = smov %s2012_s16 }
 0x1e9   : > { %s3319_s16 = smov %s3321_s20  ;;  %15 = sbr.rel (!%p13_p6) target bundleno = 4 (0x4), region = 91 }
 0x1f0   :  { %1543 = vsyncpa [#allocation4], 1 }
 0x1f1   :  { %1545 = vsyncpa [#allocation4 + $0x1], 1 }

</bundles_post_ra>
